<compile_context>
chip_gen: v5e
topology: v5e:2x2
jax: 0.10.0
libtpu: 0.0.40
codegen_flags: <defaults>
</compile_context>

<pallas_src>
import functools

import jax
import jax.numpy as jnp
from jax.experimental import pallas as pl
from jax.experimental.pallas import tpu as pltpu

BN_EPS = 1e-5
HID = 512          # IC / end hidden width (already a multiple of 128)
SUBLANE = 8        # f32 sublane count
LANE = 128         # lane width
MAX_BATCH_TILE = 512


# ------------------------------- Pallas kernel -------------------------------

def fused_sdn_kernel(add_ic, x_ref, bw_ref, bb_ref,
                     hw1_ref, hb1_ref, hw2_ref, hb2_ref,
                     ew1_ref, eb1_ref, ew2_ref, eb2_ref, ew3_ref, eb3_ref,
                     *out_refs):
    """Entire FCN_SDN_3 forward for one batch tile, activation resident in VMEM.

    add_ic is a static Python tuple, so the layer loop is unrolled at trace time.
    BN is already folded into (bw, bb). Dropout is identity (eval mode).
    """
    fwd = x_ref[...]                                    # (TB, F_pad)
    ic = 0
    for layer_id, add_output in enumerate(add_ic):
        # FullyBlockWOutput: Linear(+folded BN) -> ReLU
        y = jnp.dot(fwd, bw_ref[layer_id], preferred_element_type=jnp.float32)
        y = y + bb_ref[layer_id]                        # (TB,F) + (1,F)
        fwd = jnp.maximum(y, 0.0)
        if add_output:
            # IC head: Linear(C,512) -> (Dropout=id) -> Linear(512,K)
            h = jnp.dot(fwd, hw1_ref[ic], preferred_element_type=jnp.float32)
            h = h + hb1_ref[ic]
            logits = jnp.dot(h, hw2_ref[ic], preferred_element_type=jnp.float32)
            logits = logits + hb2_ref[ic]
            out_refs[ic][...] = logits.astype(out_refs[ic].dtype)
            ic += 1
    # End block: Linear(C,C) -> Linear(C,512) -> Linear(512,K)  (Dropout = id)
    h = jnp.dot(fwd, ew1_ref[...], preferred_element_type=jnp.float32) + eb1_ref[...]
    h = jnp.dot(h, ew2_ref[...], preferred_element_type=jnp.float32) + eb2_ref[...]
    logits = jnp.dot(h, ew3_ref[...], preferred_element_type=jnp.float32) + eb3_ref[...]
    out_refs[-1][...] = logits.astype(out_refs[-1].dtype)


# ------------------------------ forward wrapper ------------------------------

def _round_up(n, m):
    return ((n + m - 1) // m) * m


def _pad2(a, rows, cols):
    r, c = a.shape
    return jnp.pad(a, ((0, rows - r), (0, cols - c)))


@functools.partial(jax.jit, static_argnames=("add_ic", "num_classes"))
def fcn_sdn_forward(x, params, add_ic, num_classes):
    """Returns a list of logits: one per internal classifier + the final one."""
    B, input_size = x.shape
    C = params["blocks"][0]["w"].shape[1]
    num_ic = sum(1 for a in add_ic if a)
    L = len(add_ic)

    feat_pad = _round_up(max(input_size, C, LANE), LANE)   # lane-dense feature width
    k_pad = _round_up(max(num_classes, LANE), LANE)        # lane-dense logits width

    # Batch tiling: one grid step per TB rows; weights stay resident across steps.
    B8 = _round_up(max(B, SUBLANE), SUBLANE)
    TB = min(MAX_BATCH_TILE, B8)
    B_pad = _round_up(B8, TB)
    n_tiles = B_pad // TB

    # --- fold BN(eval) into each block's Linear, pad, stack (L, F, F)
    bw_list, bb_list = [], []
    for blk in params["blocks"]:
        bn = blk["bn"]
        scale = bn["gamma"] * jax.lax.rsqrt(bn["var"] + BN_EPS)     # (1, C)
        w_f = blk["w"] * scale                                       # (Din, C)
        b_f = (blk["b"] - bn["mean"]) * scale + bn["beta"]           # (1, C)
        bw_list.append(_pad2(w_f, feat_pad, feat_pad))
        bb_list.append(_pad2(b_f, 1, feat_pad))
    bw = jnp.stack(bw_list)                                          # (L,F,F)
    bb = jnp.stack(bb_list)                                          # (L,1,F)

    # --- stack & pad IC head weights (dummy slot if there are no ICs)
    hw1_l, hb1_l, hw2_l, hb2_l = [], [], [], []
    for layer_id, a in enumerate(add_ic):
        if a:
            w1, b1, w2, b2 = params["heads"][layer_id]
            hw1_l.append(_pad2(w1, feat_pad, HID))
            hb1_l.append(_pad2(b1, 1, HID))
            hw2_l.append(_pad2(w2, HID, k_pad))
            hb2_l.append(_pad2(b2, 1, k_pad))
    if num_ic == 0:  # keep stacked shapes valid; kernel never reads them
        hw1_l = [jnp.zeros((feat_pad, HID), jnp.float32)]
        hb1_l = [jnp.zeros((1, HID), jnp.float32)]
        hw2_l = [jnp.zeros((HID, k_pad), jnp.float32)]
        hb2_l = [jnp.zeros((1, k_pad), jnp.float32)]
    hw1, hb1 = jnp.stack(hw1_l), jnp.stack(hb1_l)
    hw2, hb2 = jnp.stack(hw2_l), jnp.stack(hb2_l)
    NH = hw1.shape[0]

    # --- pad end block
    ew1, eb1, ew2, eb2, ew3, eb3 = params["end"]
    ew1 = _pad2(ew1, feat_pad, feat_pad); eb1 = _pad2(eb1, 1, feat_pad)
    ew2 = _pad2(ew2, feat_pad, HID);      eb2 = _pad2(eb2, 1, HID)
    ew3 = _pad2(ew3, HID, k_pad);         eb3 = _pad2(eb3, 1, k_pad)

    # --- pad input (zero-filled padded rows/cols contribute nothing)
    x_pad = jnp.pad(x.astype(jnp.float32),
                    ((0, B_pad - B), (0, feat_pad - input_size)))

    n_out = num_ic + 1
    kernel = functools.partial(fused_sdn_kernel, tuple(add_ic))

    # Batch-tiled activation/output specs; constant block index for all weights
    # (fetched once, resident in VMEM across the whole grid).
    const3 = lambda i: (0, 0, 0)
    const2 = lambda i: (0, 0)
    row = lambda i: (i, 0)

    in_specs = [
        pl.BlockSpec((TB, feat_pad), row),                 # x
        pl.BlockSpec((L, feat_pad, feat_pad), const3),     # bw
        pl.BlockSpec((L, 1, feat_pad), const3),            # bb
        pl.BlockSpec((NH, feat_pad, HID), const3),         # hw1
        pl.BlockSpec((NH, 1, HID), const3),                # hb1
        pl.BlockSpec((NH, HID, k_pad), const3),            # hw2
        pl.BlockSpec((NH, 1, k_pad), const3),              # hb2
        pl.BlockSpec((feat_pad, feat_pad), const2),        # ew1
        pl.BlockSpec((1, feat_pad), const2),               # eb1
        pl.BlockSpec((feat_pad, HID), const2),             # ew2
        pl.BlockSpec((1, HID), const2),                    # eb2
        pl.BlockSpec((HID, k_pad), const2),                # ew3
        pl.BlockSpec((1, k_pad), const2),                  # eb3
    ]
    out_specs = tuple(pl.BlockSpec((TB, k_pad), row) for _ in range(n_out))

    outs = pl.pallas_call(
        kernel,
        out_shape=tuple(jax.ShapeDtypeStruct((B_pad, k_pad), jnp.float32)
                        for _ in range(n_out)),
        grid=(n_tiles,),
        in_specs=in_specs,
        out_specs=out_specs,
        compiler_params=pltpu.CompilerParams(
            dimension_semantics=("parallel",)),
    )(x_pad, bw, bb, hw1, hb1, hw2, hb2, ew1, eb1, ew2, eb2, ew3, eb3)

    return [o[:B, :num_classes] for o in outs]


# ------------------------------ model parameters -----------------------------

def init_linear(key, din, dout, dtype=jnp.float32):
    # matches initialize_weights: weight ~ N(0, 0.01), bias = 0
    w = 0.01 * jax.random.normal(key, (din, dout), dtype=dtype)
    b = jnp.zeros((1, dout), dtype=dtype)
    return w, b


def init_fcn_sdn_3_params(key, input_size, in_channels, num_classes, add_ic):
    params = {"blocks": [], "heads": {}, "end": None}
    keys = jax.random.split(key, 2 * len(add_ic) + 4)
    k_idx = 0
    for layer_id, add_output in enumerate(add_ic):
        din = input_size if layer_id == 0 else in_channels
        w, b = init_linear(keys[k_idx], din, in_channels); k_idx += 1
        bn = {
            "gamma": jnp.ones((1, in_channels), jnp.float32),
            "beta": jnp.zeros((1, in_channels), jnp.float32),
            "mean": jnp.zeros((1, in_channels), jnp.float32),
            "var": jnp.ones((1, in_channels), jnp.float32),
        }
        params["blocks"].append({"w": w, "b": b, "bn": bn})
        if add_output:
            k1, k2 = jax.random.split(keys[k_idx]); k_idx += 1
            hw1, hb1 = init_linear(k1, in_channels, HID)
            hw2, hb2 = init_linear(k2, HID, num_classes)
            params["heads"][layer_id] = (hw1, hb1, hw2, hb2)
    ke1, ke2, ke3 = keys[k_idx], keys[k_idx + 1], keys[k_idx + 2]
    ew1, eb1 = init_linear(ke1, in_channels, in_channels)
    ew2, eb2 = init_linear(ke2, in_channels, HID)
    ew3, eb3 = init_linear(ke3, HID, num_classes)
    params["end"] = (ew1, eb1, ew2, eb2, ew3, eb3)
    return params


# Pure-JAX reference (unfolded BN, unpadded) for correctness checking.
def reference_forward(x, params, add_ic):
    outs = []
    fwd = x
    for layer_id, add_output in enumerate(add_ic):
        blk = params["blocks"][layer_id]
        y = fwd @ blk["w"] + blk["b"]
        bn = blk["bn"]
        y = (y - bn["mean"]) * jax.lax.rsqrt(bn["var"] + BN_EPS) * bn["gamma"] + bn["beta"]
        fwd = jnp.maximum(y, 0.0)
        if add_output:
            hw1, hb1, hw2, hb2 = params["heads"][layer_id]
            outs.append((fwd @ hw1 + hb1) @ hw2 + hb2)
    ew1, eb1, ew2, eb2, ew3, eb3 = params["end"]
    h = fwd @ ew1 + eb1
    h = h @ ew2 + eb2
    outs.append(h @ ew3 + eb3)
    return outs


# ---------------------------------- main ------------------------------------

if __name__ == "__main__":
    # Small, module-consistent config (FCN_SDN_3 uses in_channels[2]).
    module_params = {
        "input_size": 16,
        "num_classes": 10,
        "augment_training": False,
        "init_weights": True,
        "add_ic": (0, 1, 0, 1),            # 2 internal classifiers -> 3 outputs total
        "in_channels": [8, 16, 24, 32],    # FCN_SDN_3 -> index 2 -> 24
    }
    input_size = int(module_params["input_size"])
    num_classes = int(module_params["num_classes"])
    add_ic = tuple(module_params["add_ic"])
    in_channels = module_params["in_channels"][2]
    batch = 4

    # TODO(synk): train_func/test_func (mf.sdn_train/sdn_test) and the early-exit
    # control-flow variants are host-side / data-dependent loops, not kernels.

    key = jax.random.PRNGKey(0)
    k_params, k_x = jax.random.split(key)
    params = init_fcn_sdn_3_params(k_params, input_size, in_channels,
                                   num_classes, add_ic)
    x = jax.random.normal(k_x, (batch, input_size), dtype=jnp.float32)

    outputs = fcn_sdn_forward(x, params, add_ic, num_classes)
    outputs = [jax.block_until_ready(o) for o in outputs]

    # Sanity: expected number of outputs and shapes, and match pure-JAX reference.
    expected_num_outputs = sum(add_ic) + 1
    assert len(outputs) == expected_num_outputs, (len(outputs), expected_num_outputs)
    for o in outputs:
        assert o.shape == (batch, num_classes), o.shape

    refs = reference_forward(x, params, add_ic)
    for o, r in zip(outputs, refs):
        assert jnp.allclose(o, r, atol=1e-5, rtol=1e-5), float(jnp.max(jnp.abs(o - r)))

    print("KERNEL_OK")
</pallas_src>

<mosaic_0001>
module attributes {stable_mosaic.version = 11 : i64} {
  func.func @fused_sdn_kernel(%arg0: i32, %arg1: memref<8x128xf32, #tpu.memory_space<vmem>>, %arg2: memref<4x128x128xf32, #tpu.memory_space<vmem>>, %arg3: memref<4x1x128xf32, #tpu.memory_space<vmem>>, %arg4: memref<2x128x512xf32, #tpu.memory_space<vmem>>, %arg5: memref<2x1x512xf32, #tpu.memory_space<vmem>>, %arg6: memref<2x512x128xf32, #tpu.memory_space<vmem>>, %arg7: memref<2x1x128xf32, #tpu.memory_space<vmem>>, %arg8: memref<128x128xf32, #tpu.memory_space<vmem>>, %arg9: memref<1x128xf32, #tpu.memory_space<vmem>>, %arg10: memref<128x512xf32, #tpu.memory_space<vmem>>, %arg11: memref<1x512xf32, #tpu.memory_space<vmem>>, %arg12: memref<512x128xf32, #tpu.memory_space<vmem>>, %arg13: memref<1x128xf32, #tpu.memory_space<vmem>>, %arg14: memref<8x128xf32, #tpu.memory_space<vmem>>, %arg15: memref<8x128xf32, #tpu.memory_space<vmem>>, %arg16: memref<8x128xf32, #tpu.memory_space<vmem>>) attributes {dimension_semantics = [#tpu.dimension_semantics<parallel>], iteration_bounds = array<i64: 1>, scalar_prefetch = 0 : i64, scratch_operands = 0 : i64, tpu.core_type = #tpu.core_type<tc>, window_params = [{transform_indices = @transform_0, window_bounds = array<i64: 8, 128>}, {pipeline_mode = #tpu.pipeline_mode<synchronous>, transform_indices = @transform_1, window_bounds = array<i64: 4, 128, 128>}, {pipeline_mode = #tpu.pipeline_mode<synchronous>, transform_indices = @transform_2, window_bounds = array<i64: 4, 1, 128>}, {pipeline_mode = #tpu.pipeline_mode<synchronous>, transform_indices = @transform_3, window_bounds = array<i64: 2, 128, 512>}, {pipeline_mode = #tpu.pipeline_mode<synchronous>, transform_indices = @transform_4, window_bounds = array<i64: 2, 1, 512>}, {pipeline_mode = #tpu.pipeline_mode<synchronous>, transform_indices = @transform_5, window_bounds = array<i64: 2, 512, 128>}, {pipeline_mode = #tpu.pipeline_mode<synchronous>, transform_indices = @transform_6, window_bounds = array<i64: 2, 1, 128>}, {pipeline_mode = #tpu.pipeline_mode<synchronous>, transform_indices = @transform_7, window_bounds = array<i64: 128, 128>}, {pipeline_mode = #tpu.pipeline_mode<synchronous>, transform_indices = @transform_8, window_bounds = array<i64: 1, 128>}, {pipeline_mode = #tpu.pipeline_mode<synchronous>, transform_indices = @transform_9, window_bounds = array<i64: 128, 512>}, {pipeline_mode = #tpu.pipeline_mode<synchronous>, transform_indices = @transform_10, window_bounds = array<i64: 1, 512>}, {pipeline_mode = #tpu.pipeline_mode<synchronous>, transform_indices = @transform_11, window_bounds = array<i64: 512, 128>}, {pipeline_mode = #tpu.pipeline_mode<synchronous>, transform_indices = @transform_12, window_bounds = array<i64: 1, 128>}, {transform_indices = @transform_13, window_bounds = array<i64: 8, 128>}, {transform_indices = @transform_14, window_bounds = array<i64: 8, 128>}, {transform_indices = @transform_15, window_bounds = array<i64: 8, 128>}]} {
    %c0 = arith.constant 0 : index
    %c0_0 = arith.constant 0 : index
    %0 = vector.load %arg1[%c0, %c0_0] : memref<8x128xf32, #tpu.memory_space<vmem>>, vector<8x128xf32>
    %c0_1 = arith.constant 0 : index
    %c0_2 = arith.constant 0 : index
    %c0_3 = arith.constant 0 : index
    %1 = vector.load %arg2[%c0_1, %c0_2, %c0_3] : memref<4x128x128xf32, #tpu.memory_space<vmem>>, vector<1x128x128xf32>
    %2 = vector.shape_cast %1 : vector<1x128x128xf32> to vector<128x128xf32>
    %cst = arith.constant dense<0.000000e+00> : vector<8x128xf32>
    %3 = tpu.matmul %0, %2, %cst {dimension_numbers = #tpu.dot_dimension_numbers<[1], [0], [0], [1], [0, 0, 1, 1], [], []>} : vector<8x128xf32>, vector<128x128xf32>, vector<8x128xf32> -> vector<8x128xf32>
    %c0_4 = arith.constant 0 : index
    %c0_5 = arith.constant 0 : index
    %c0_6 = arith.constant 0 : index
    %4 = vector.load %arg3[%c0_4, %c0_5, %c0_6] : memref<4x1x128xf32, #tpu.memory_space<vmem>>, vector<1x1x128xf32>
    %5 = vector.shape_cast %4 : vector<1x1x128xf32> to vector<1x128xf32>
    %6 = vector.broadcast %5 : vector<1x128xf32> to vector<8x128xf32>
    %7 = arith.addf %3, %6 : vector<8x128xf32>
    %cst_7 = arith.constant 0.000000e+00 : f32
    %8 = vector.broadcast %cst_7 : f32 to vector<8x128xf32>
    %9 = arith.maximumf %7, %8 : vector<8x128xf32>
    %c1 = arith.constant 1 : index
    %c0_8 = arith.constant 0 : index
    %c0_9 = arith.constant 0 : index
    %10 = vector.load %arg2[%c1, %c0_8, %c0_9] : memref<4x128x128xf32, #tpu.memory_space<vmem>>, vector<1x128x128xf32>
    %11 = vector.shape_cast %10 : vector<1x128x128xf32> to vector<128x128xf32>
    %cst_10 = arith.constant dense<0.000000e+00> : vector<8x128xf32>
    %12 = tpu.matmul %9, %11, %cst_10 {dimension_numbers = #tpu.dot_dimension_numbers<[1], [0], [0], [1], [0, 0, 1, 1], [], []>} : vector<8x128xf32>, vector<128x128xf32>, vector<8x128xf32> -> vector<8x128xf32>
    %c1_11 = arith.constant 1 : index
    %c0_12 = arith.constant 0 : index
    %c0_13 = arith.constant 0 : index
    %13 = vector.load %arg3[%c1_11, %c0_12, %c0_13] : memref<4x1x128xf32, #tpu.memory_space<vmem>>, vector<1x1x128xf32>
    %14 = vector.shape_cast %13 : vector<1x1x128xf32> to vector<1x128xf32>
    %15 = vector.broadcast %14 : vector<1x128xf32> to vector<8x128xf32>
    %16 = arith.addf %12, %15 : vector<8x128xf32>
    %cst_14 = arith.constant 0.000000e+00 : f32
    %17 = vector.broadcast %cst_14 : f32 to vector<8x128xf32>
    %18 = arith.maximumf %16, %17 : vector<8x128xf32>
    %c0_15 = arith.constant 0 : index
    %c0_16 = arith.constant 0 : index
    %c0_17 = arith.constant 0 : index
    %19 = vector.load %arg4[%c0_15, %c0_16, %c0_17] : memref<2x128x512xf32, #tpu.memory_space<vmem>>, vector<1x128x512xf32>
    %20 = vector.shape_cast %19 : vector<1x128x512xf32> to vector<128x512xf32>
    %cst_18 = arith.constant dense<0.000000e+00> : vector<8x512xf32>
    %21 = tpu.matmul %18, %20, %cst_18 {dimension_numbers = #tpu.dot_dimension_numbers<[1], [0], [0], [1], [0, 0, 1, 1], [], []>} : vector<8x128xf32>, vector<128x512xf32>, vector<8x512xf32> -> vector<8x512xf32>
    %c0_19 = arith.constant 0 : index
    %c0_20 = arith.constant 0 : index
    %c0_21 = arith.constant 0 : index
    %22 = vector.load %arg5[%c0_19, %c0_20, %c0_21] : memref<2x1x512xf32, #tpu.memory_space<vmem>>, vector<1x1x512xf32>
    %23 = vector.shape_cast %22 : vector<1x1x512xf32> to vector<1x512xf32>
    %24 = vector.broadcast %23 : vector<1x512xf32> to vector<8x512xf32>
    %25 = arith.addf %21, %24 : vector<8x512xf32>
    %c0_22 = arith.constant 0 : index
    %c0_23 = arith.constant 0 : index
    %c0_24 = arith.constant 0 : index
    %26 = vector.load %arg6[%c0_22, %c0_23, %c0_24] : memref<2x512x128xf32, #tpu.memory_space<vmem>>, vector<1x512x128xf32>
    %27 = vector.shape_cast %26 : vector<1x512x128xf32> to vector<512x128xf32>
    %cst_25 = arith.constant dense<0.000000e+00> : vector<8x128xf32>
    %28 = tpu.matmul %25, %27, %cst_25 {dimension_numbers = #tpu.dot_dimension_numbers<[1], [0], [0], [1], [0, 0, 1, 1], [], []>} : vector<8x512xf32>, vector<512x128xf32>, vector<8x128xf32> -> vector<8x128xf32>
    %c0_26 = arith.constant 0 : index
    %c0_27 = arith.constant 0 : index
    %c0_28 = arith.constant 0 : index
    %29 = vector.load %arg7[%c0_26, %c0_27, %c0_28] : memref<2x1x128xf32, #tpu.memory_space<vmem>>, vector<1x1x128xf32>
    %30 = vector.shape_cast %29 : vector<1x1x128xf32> to vector<1x128xf32>
    %31 = vector.broadcast %30 : vector<1x128xf32> to vector<8x128xf32>
    %32 = arith.addf %28, %31 : vector<8x128xf32>
    %c0_29 = arith.constant 0 : index
    %c0_30 = arith.constant 0 : index
    %33 = vector.load %arg14[%c0_29, %c0_30] : memref<8x128xf32, #tpu.memory_space<vmem>>, vector<8x128xf32>
    tpu.vector_store %arg14[%c0_29, %c0_30], %32 {strides = array<i32>} : memref<8x128xf32, #tpu.memory_space<vmem>>, vector<8x128xf32>,
    %c2 = arith.constant 2 : index
    %c0_31 = arith.constant 0 : index
    %c0_32 = arith.constant 0 : index
    %34 = vector.load %arg2[%c2, %c0_31, %c0_32] : memref<4x128x128xf32, #tpu.memory_space<vmem>>, vector<1x128x128xf32>
    %35 = vector.shape_cast %34 : vector<1x128x128xf32> to vector<128x128xf32>
    %cst_33 = arith.constant dense<0.000000e+00> : vector<8x128xf32>
    %36 = tpu.matmul %18, %35, %cst_33 {dimension_numbers = #tpu.dot_dimension_numbers<[1], [0], [0], [1], [0, 0, 1, 1], [], []>} : vector<8x128xf32>, vector<128x128xf32>, vector<8x128xf32> -> vector<8x128xf32>
    %c2_34 = arith.constant 2 : index
    %c0_35 = arith.constant 0 : index
    %c0_36 = arith.constant 0 : index
    %37 = vector.load %arg3[%c2_34, %c0_35, %c0_36] : memref<4x1x128xf32, #tpu.memory_space<vmem>>, vector<1x1x128xf32>
    %38 = vector.shape_cast %37 : vector<1x1x128xf32> to vector<1x128xf32>
    %39 = vector.broadcast %38 : vector<1x128xf32> to vector<8x128xf32>
    %40 = arith.addf %36, %39 : vector<8x128xf32>
    %cst_37 = arith.constant 0.000000e+00 : f32
    %41 = vector.broadcast %cst_37 : f32 to vector<8x128xf32>
    %42 = arith.maximumf %40, %41 : vector<8x128xf32>
    %c3 = arith.constant 3 : index
    %c0_38 = arith.constant 0 : index
    %c0_39 = arith.constant 0 : index
    %43 = vector.load %arg2[%c3, %c0_38, %c0_39] : memref<4x128x128xf32, #tpu.memory_space<vmem>>, vector<1x128x128xf32>
    %44 = vector.shape_cast %43 : vector<1x128x128xf32> to vector<128x128xf32>
    %cst_40 = arith.constant dense<0.000000e+00> : vector<8x128xf32>
    %45 = tpu.matmul %42, %44, %cst_40 {dimension_numbers = #tpu.dot_dimension_numbers<[1], [0], [0], [1], [0, 0, 1, 1], [], []>} : vector<8x128xf32>, vector<128x128xf32>, vector<8x128xf32> -> vector<8x128xf32>
    %c3_41 = arith.constant 3 : index
    %c0_42 = arith.constant 0 : index
    %c0_43 = arith.constant 0 : index
    %46 = vector.load %arg3[%c3_41, %c0_42, %c0_43] : memref<4x1x128xf32, #tpu.memory_space<vmem>>, vector<1x1x128xf32>
    %47 = vector.shape_cast %46 : vector<1x1x128xf32> to vector<1x128xf32>
    %48 = vector.broadcast %47 : vector<1x128xf32> to vector<8x128xf32>
    %49 = arith.addf %45, %48 : vector<8x128xf32>
    %cst_44 = arith.constant 0.000000e+00 : f32
    %50 = vector.broadcast %cst_44 : f32 to vector<8x128xf32>
    %51 = arith.maximumf %49, %50 : vector<8x128xf32>
    %c1_45 = arith.constant 1 : index
    %c0_46 = arith.constant 0 : index
    %c0_47 = arith.constant 0 : index
    %52 = vector.load %arg4[%c1_45, %c0_46, %c0_47] : memref<2x128x512xf32, #tpu.memory_space<vmem>>, vector<1x128x512xf32>
    %53 = vector.shape_cast %52 : vector<1x128x512xf32> to vector<128x512xf32>
    %cst_48 = arith.constant dense<0.000000e+00> : vector<8x512xf32>
    %54 = tpu.matmul %51, %53, %cst_48 {dimension_numbers = #tpu.dot_dimension_numbers<[1], [0], [0], [1], [0, 0, 1, 1], [], []>} : vector<8x128xf32>, vector<128x512xf32>, vector<8x512xf32> -> vector<8x512xf32>
    %c1_49 = arith.constant 1 : index
    %c0_50 = arith.constant 0 : index
    %c0_51 = arith.constant 0 : index
    %55 = vector.load %arg5[%c1_49, %c0_50, %c0_51] : memref<2x1x512xf32, #tpu.memory_space<vmem>>, vector<1x1x512xf32>
    %56 = vector.shape_cast %55 : vector<1x1x512xf32> to vector<1x512xf32>
    %57 = vector.broadcast %56 : vector<1x512xf32> to vector<8x512xf32>
    %58 = arith.addf %54, %57 : vector<8x512xf32>
    %c1_52 = arith.constant 1 : index
    %c0_53 = arith.constant 0 : index
    %c0_54 = arith.constant 0 : index
    %59 = vector.load %arg6[%c1_52, %c0_53, %c0_54] : memref<2x512x128xf32, #tpu.memory_space<vmem>>, vector<1x512x128xf32>
    %60 = vector.shape_cast %59 : vector<1x512x128xf32> to vector<512x128xf32>
    %cst_55 = arith.constant dense<0.000000e+00> : vector<8x128xf32>
    %61 = tpu.matmul %58, %60, %cst_55 {dimension_numbers = #tpu.dot_dimension_numbers<[1], [0], [0], [1], [0, 0, 1, 1], [], []>} : vector<8x512xf32>, vector<512x128xf32>, vector<8x128xf32> -> vector<8x128xf32>
    %c1_56 = arith.constant 1 : index
    %c0_57 = arith.constant 0 : index
    %c0_58 = arith.constant 0 : index
    %62 = vector.load %arg7[%c1_56, %c0_57, %c0_58] : memref<2x1x128xf32, #tpu.memory_space<vmem>>, vector<1x1x128xf32>
    %63 = vector.shape_cast %62 : vector<1x1x128xf32> to vector<1x128xf32>
    %64 = vector.broadcast %63 : vector<1x128xf32> to vector<8x128xf32>
    %65 = arith.addf %61, %64 : vector<8x128xf32>
    %c0_59 = arith.constant 0 : index
    %c0_60 = arith.constant 0 : index
    %66 = vector.load %arg15[%c0_59, %c0_60] : memref<8x128xf32, #tpu.memory_space<vmem>>, vector<8x128xf32>
    tpu.vector_store %arg15[%c0_59, %c0_60], %65 {strides = array<i32>} : memref<8x128xf32, #tpu.memory_space<vmem>>, vector<8x128xf32>,
    %c0_61 = arith.constant 0 : index
    %c0_62 = arith.constant 0 : index
    %67 = vector.load %arg8[%c0_61, %c0_62] : memref<128x128xf32, #tpu.memory_space<vmem>>, vector<128x128xf32>
    %cst_63 = arith.constant dense<0.000000e+00> : vector<8x128xf32>
    %68 = tpu.matmul %51, %67, %cst_63 {dimension_numbers = #tpu.dot_dimension_numbers<[1], [0], [0], [1], [0, 0, 1, 1], [], []>} : vector<8x128xf32>, vector<128x128xf32>, vector<8x128xf32> -> vector<8x128xf32>
    %c0_64 = arith.constant 0 : index
    %c0_65 = arith.constant 0 : index
    %69 = vector.load %arg9[%c0_64, %c0_65] : memref<1x128xf32, #tpu.memory_space<vmem>>, vector<1x128xf32>
    %70 = vector.broadcast %69 : vector<1x128xf32> to vector<8x128xf32>
    %71 = arith.addf %68, %70 : vector<8x128xf32>
    %c0_66 = arith.constant 0 : index
    %c0_67 = arith.constant 0 : index
    %72 = vector.load %arg10[%c0_66, %c0_67] : memref<128x512xf32, #tpu.memory_space<vmem>>, vector<128x512xf32>
    %cst_68 = arith.constant dense<0.000000e+00> : vector<8x512xf32>
    %73 = tpu.matmul %71, %72, %cst_68 {dimension_numbers = #tpu.dot_dimension_numbers<[1], [0], [0], [1], [0, 0, 1, 1], [], []>} : vector<8x128xf32>, vector<128x512xf32>, vector<8x512xf32> -> vector<8x512xf32>
    %c0_69 = arith.constant 0 : index
    %c0_70 = arith.constant 0 : index
    %74 = vector.load %arg11[%c0_69, %c0_70] : memref<1x512xf32, #tpu.memory_space<vmem>>, vector<1x512xf32>
    %75 = vector.broadcast %74 : vector<1x512xf32> to vector<8x512xf32>
    %76 = arith.addf %73, %75 : vector<8x512xf32>
    %c0_71 = arith.constant 0 : index
    %c0_72 = arith.constant 0 : index
    %77 = vector.load %arg12[%c0_71, %c0_72] : memref<512x128xf32, #tpu.memory_space<vmem>>, vector<512x128xf32>
    %cst_73 = arith.constant dense<0.000000e+00> : vector<8x128xf32>
    %78 = tpu.matmul %76, %77, %cst_73 {dimension_numbers = #tpu.dot_dimension_numbers<[1], [0], [0], [1], [0, 0, 1, 1], [], []>} : vector<8x512xf32>, vector<512x128xf32>, vector<8x128xf32> -> vector<8x128xf32>
    %c0_74 = arith.constant 0 : index
    %c0_75 = arith.constant 0 : index
    %79 = vector.load %arg13[%c0_74, %c0_75] : memref<1x128xf32, #tpu.memory_space<vmem>>, vector<1x128xf32>
    %80 = vector.broadcast %79 : vector<1x128xf32> to vector<8x128xf32>
    %81 = arith.addf %78, %80 : vector<8x128xf32>
    %c0_76 = arith.constant 0 : index
    %c0_77 = arith.constant 0 : index
    %82 = vector.load %arg16[%c0_76, %c0_77] : memref<8x128xf32, #tpu.memory_space<vmem>>, vector<8x128xf32>
    tpu.vector_store %arg16[%c0_76, %c0_77], %81 {strides = array<i32>} : memref<8x128xf32, #tpu.memory_space<vmem>>, vector<8x128xf32>,
    return
  }
  func.func @transform_0(%arg0: i32) -> (i32, i32) {
    %c0_i32 = arith.constant 0 : i32
    %c0_i32_0 = arith.constant 0 : i32
    return %arg0, %c0_i32 : i32, i32
  }
  func.func @transform_1(%arg0: i32) -> (i32, i32, i32) {
    %c0_i32 = arith.constant 0 : i32
    %c0_i32_0 = arith.constant 0 : i32
    %c0_i32_1 = arith.constant 0 : i32
    %c0_i32_2 = arith.constant 0 : i32
    return %c0_i32, %c0_i32_0, %c0_i32_1 : i32, i32, i32
  }
  func.func @transform_2(%arg0: i32) -> (i32, i32, i32) {
    %c0_i32 = arith.constant 0 : i32
    %c0_i32_0 = arith.constant 0 : i32
    %c0_i32_1 = arith.constant 0 : i32
    %c0_i32_2 = arith.constant 0 : i32
    return %c0_i32, %c0_i32_0, %c0_i32_1 : i32, i32, i32
  }
  func.func @transform_3(%arg0: i32) -> (i32, i32, i32) {
    %c0_i32 = arith.constant 0 : i32
    %c0_i32_0 = arith.constant 0 : i32
    %c0_i32_1 = arith.constant 0 : i32
    %c0_i32_2 = arith.constant 0 : i32
    return %c0_i32, %c0_i32_0, %c0_i32_1 : i32, i32, i32
  }
  func.func @transform_4(%arg0: i32) -> (i32, i32, i32) {
    %c0_i32 = arith.constant 0 : i32
    %c0_i32_0 = arith.constant 0 : i32
    %c0_i32_1 = arith.constant 0 : i32
    %c0_i32_2 = arith.constant 0 : i32
    return %c0_i32, %c0_i32_0, %c0_i32_1 : i32, i32, i32
  }
  func.func @transform_5(%arg0: i32) -> (i32, i32, i32) {
    %c0_i32 = arith.constant 0 : i32
    %c0_i32_0 = arith.constant 0 : i32
    %c0_i32_1 = arith.constant 0 : i32
    %c0_i32_2 = arith.constant 0 : i32
    return %c0_i32, %c0_i32_0, %c0_i32_1 : i32, i32, i32
  }
  func.func @transform_6(%arg0: i32) -> (i32, i32, i32) {
    %c0_i32 = arith.constant 0 : i32
    %c0_i32_0 = arith.constant 0 : i32
    %c0_i32_1 = arith.constant 0 : i32
    %c0_i32_2 = arith.constant 0 : i32
    return %c0_i32, %c0_i32_0, %c0_i32_1 : i32, i32, i32
  }
  func.func @transform_7(%arg0: i32) -> (i32, i32) {
    %c0_i32 = arith.constant 0 : i32
    %c0_i32_0 = arith.constant 0 : i32
    %c0_i32_1 = arith.constant 0 : i32
    return %c0_i32, %c0_i32_0 : i32, i32
  }
  func.func @transform_8(%arg0: i32) -> (i32, i32) {
    %c0_i32 = arith.constant 0 : i32
    %c0_i32_0 = arith.constant 0 : i32
    %c0_i32_1 = arith.constant 0 : i32
    return %c0_i32, %c0_i32_0 : i32, i32
  }
  func.func @transform_9(%arg0: i32) -> (i32, i32) {
    %c0_i32 = arith.constant 0 : i32
    %c0_i32_0 = arith.constant 0 : i32
    %c0_i32_1 = arith.constant 0 : i32
    return %c0_i32, %c0_i32_0 : i32, i32
  }
  func.func @transform_10(%arg0: i32) -> (i32, i32) {
    %c0_i32 = arith.constant 0 : i32
    %c0_i32_0 = arith.constant 0 : i32
    %c0_i32_1 = arith.constant 0 : i32
    return %c0_i32, %c0_i32_0 : i32, i32
  }
  func.func @transform_11(%arg0: i32) -> (i32, i32) {
    %c0_i32 = arith.constant 0 : i32
    %c0_i32_0 = arith.constant 0 : i32
    %c0_i32_1 = arith.constant 0 : i32
    return %c0_i32, %c0_i32_0 : i32, i32
  }
  func.func @transform_12(%arg0: i32) -> (i32, i32) {
    %c0_i32 = arith.constant 0 : i32
    %c0_i32_0 = arith.constant 0 : i32
    %c0_i32_1 = arith.constant 0 : i32
    return %c0_i32, %c0_i32_0 : i32, i32
  }
  func.func @transform_13(%arg0: i32) -> (i32, i32) {
    %c0_i32 = arith.constant 0 : i32
    %c0_i32_0 = arith.constant 0 : i32
    return %arg0, %c0_i32 : i32, i32
  }
  func.func @transform_14(%arg0: i32) -> (i32, i32) {
    %c0_i32 = arith.constant 0 : i32
    %c0_i32_0 = arith.constant 0 : i32
    return %arg0, %c0_i32 : i32, i32
  }
  func.func @transform_15(%arg0: i32) -> (i32, i32) {
    %c0_i32 = arith.constant 0 : i32
    %c0_i32_0 = arith.constant 0 : i32
    return %arg0, %c0_i32 : i32, i32
  }
}

</mosaic_0001>

<bundles_post_ra>
// kernel: fcn_sdn_forward.1
= control target key start
LH: loop header
LB: loop body
LE: loop exit
PB: predicated region body
PF: predicated region fallthrough
CT: control target
= control target key end

     0   :  { %s2903_s1 = inlined_call_operand.vmem [shape: f32[4,128,128], index: 1, kind: input, shape index: {}]   ;;  %s2904_s2 = inlined_call_operand.vmem [shape: f32[4,1,128], index: 2, kind: input, shape index: {}]   ;;  %s2905_s0 = inlined_call_operand.vmem [shape: f32[8,128], index: 0, kind: input, shape index: {}]   ;;  %s2906_s3 = inlined_call_operand.vmem [shape: f32[2,128,512], index: 3, kind: input, shape index: {}]   ;;  %s2907_s5 = inlined_call_operand.vmem [shape: f32[2,512,128], index: 5, kind: input, shape index: {}]   ;;  %s2908_s4 = inlined_call_operand.vmem [shape: f32[2,1,512], index: 4, kind: input, shape index: {}]   ;;  %s2909_s6 = inlined_call_operand.vmem [shape: f32[2,1,128], index: 6, kind: input, shape index: {}]   ;;  %s2910_s13 = inlined_call_operand.vmem [shape: f32[8,128], index: 13, kind: output, shape index: {0}]   ;;  %s2911_s7 = inlined_call_operand.vmem [shape: f32[128,128], index: 7, kind: input, shape index: {}]   ;;  %s2912_s9 = inlined_call_operand.vmem [shape: f32[128,512], index: 9, kind: input, shape index: {}]   ;;  %s2913_s8 = inlined_call_operand.vmem [shape: f32[1,128], index: 8, kind: input, shape index: {}]   ;;  %s2914_s11 = inlined_call_operand.vmem [shape: f32[512,128], index: 11, kind: input, shape index: {}]   ;;  %s2915_s14 = inlined_call_operand.vmem [shape: f32[8,128], index: 14, kind: output, shape index: {1}]   ;;  %s2916_s12 = inlined_call_operand.vmem [shape: f32[1,128], index: 12, kind: input, shape index: {}]   ;;  %s2917_s10 = inlined_call_operand.vmem [shape: f32[1,512], index: 10, kind: input, shape index: {}]   ;;  %s2918_s15 = inlined_call_operand.vmem [shape: f32[8,128], index: 15, kind: output, shape index: {2}]  }
   0x1   :  { %v63_v0 = vld [vmem:[%s2903_s1 + $0x78] sm:$0xff]  ;;  %v62_v1 = vld [vmem:[%s2903_s1 + $0x70] sm:$0xff]  ;;  %v61_v2 = vld [vmem:[%s2903_s1 + $0x68] sm:$0xff] }
   0x2   :  { %68 = vmatpush.msra.mxu0 %v63_v0  ;;  %v60_v3 = vld [vmem:[%s2903_s1 + $0x60] sm:$0xff]  ;;  %v1198_v4 = vld [vmem:[%s2903_s1 + $0xf8] sm:$0xff]  ;;  %v1197_v6 = vld [vmem:[%s2903_s1 + $0xf0] sm:$0xff] }
   0x3   :  { %v59_v5 = vld [vmem:[%s2903_s1 + $0x58] sm:$0xff]  ;;  %111 = vmatpush.msra.mxu1 %v1198_v4  ;;  %v1196_v7 = vld [vmem:[%s2903_s1 + $0xe8] sm:$0xff]  ;;  %v58_v8 = vld [vmem:[%s2903_s1 + $0x50] sm:$0xff] }
   0x4   :  { %69 = vmatpush.msra.mxu0 %v62_v1  ;;  %v1195_v9 = vld [vmem:[%s2903_s1 + $0xe0] sm:$0xff]  ;;  %v57_v10 = vld [vmem:[%s2903_s1 + $0x48] sm:$0xff]  ;;  %v1194_v11 = vld [vmem:[%s2903_s1 + $0xd8] sm:$0xff] }
   0x5   :  { %112 = vmatpush.msra.mxu1 %v1197_v6  ;;  %v56_v12 = vld [vmem:[%s2903_s1 + $0x40] sm:$0xff]  ;;  %v1193_v13 = vld [vmem:[%s2903_s1 + $0xd0] sm:$0xff]  ;;  %v55_v14 = vld [vmem:[%s2903_s1 + $0x38] sm:$0xff] }
   0x6   :  { %70 = vmatpush.msra.mxu0 %v61_v2  ;;  %v1192_v15 = vld [vmem:[%s2903_s1 + $0xc8] sm:$0xff]  ;;  %v54_v16 = vld [vmem:[%s2903_s1 + $0x30] sm:$0xff]  ;;  %v1191_v17 = vld [vmem:[%s2903_s1 + $0xc0] sm:$0xff] }
   0x7   :  { %113 = vmatpush.msra.mxu1 %v1196_v7  ;;  %v53_v18 = vld [vmem:[%s2903_s1 + $0x28] sm:$0xff]  ;;  %v1190_v19 = vld [vmem:[%s2903_s1 + $0xb8] sm:$0xff]  ;;  %v52_v20 = vld [vmem:[%s2903_s1 + $0x20] sm:$0xff] }
   0x8   :  { %71 = vmatpush.msra.mxu0 %v60_v3  ;;  %v1189_v21 = vld [vmem:[%s2903_s1 + $0xb0] sm:$0xff]  ;;  %v51_v22 = vld [vmem:[%s2903_s1 + $0x18] sm:$0xff]  ;;  %v1188_v23 = vld [vmem:[%s2903_s1 + $0xa8] sm:$0xff] }
   0x9   :  { %114 = vmatpush.msra.mxu1 %v1195_v9  ;;  %v50_v24 = vld [vmem:[%s2903_s1 + $0x10] sm:$0xff]  ;;  %v1187_v25 = vld [vmem:[%s2903_s1 + $0xa0] sm:$0xff]  ;;  %v49_v26 = vld [vmem:[%s2903_s1 + $0x8] sm:$0xff] }
   0xa   :  { %72 = vmatpush.msra.mxu0 %v59_v5  ;;  %v1186_v27 = vld [vmem:[%s2903_s1 + $0x98] sm:$0xff]  ;;  %v48_v28 = vld [vmem:[%s2903_s1] sm:$0xff]  ;;  %v1185_v30 = vld [vmem:[%s2903_s1 + $0x90] sm:$0xff] }
   0xb   :  { %115 = vmatpush.msra.mxu1 %v1194_v11  ;;  %v47_v29 = vld [vmem:[%s2905_s0] sm:$0xff]  ;;  %v1184_v31 = vld [vmem:[%s2903_s1 + $0x88] sm:$0xff]  ;;  %v194_v35 = vld [vmem:[%s2906_s3 + $0x1f0] sm:$0xff] }
   0xc   :  { %73 = vmatpush.msra.mxu0 %v58_v8  ;;  %v1183_v32 = vld [vmem:[%s2903_s1 + $0x80] sm:$0xff]  ;;  %v193_v34 = vld [vmem:[%s2906_s3 + $0x1e8] sm:$0xff]  ;;  %v195_v36 = vld [vmem:[%s2906_s3 + $0x1f8] sm:$0xff] }
   0xd   :  { %116 = vmatpush.msra.mxu1 %v1193_v13  ;;  %v192_v33 = vld [vmem:[%s2906_s3 + $0x1e0] sm:$0xff]  ;;  %226 = vmatpush.msra.mxu3 %v193_v34  ;;  %v189_v38 = vld [vmem:[%s2906_s3 + $0x1c8] sm:$0xff]  ;;  %v190_v39 = vld [vmem:[%s2906_s3 + $0x1d0] sm:$0xff] }
   0xe   :  { %74 = vmatpush.msra.mxu0 %v57_v10  ;;  %206 = vmatpush.msra.mxu2 %v192_v33  ;;  %v188_v37 = vld [vmem:[%s2906_s3 + $0x1c0] sm:$0xff]  ;;  %v191_v40 = vld [vmem:[%s2906_s3 + $0x1d8] sm:$0xff]  ;;  %v185_v42 = vld [vmem:[%s2906_s3 + $0x1a8] sm:$0xff] }
   0xf   :  { %117 = vmatpush.msra.mxu1 %v1192_v15  ;;  %v184_v41 = vld [vmem:[%s2906_s3 + $0x1a0] sm:$0xff]  ;;  %227 = vmatpush.msra.mxu3 %v189_v38  ;;  %v186_v43 = vld [vmem:[%s2906_s3 + $0x1b0] sm:$0xff]  ;;  %v187_v44 = vld [vmem:[%s2906_s3 + $0x1b8] sm:$0xff] }
  0x10   :  { %75 = vmatpush.msra.mxu0 %v56_v12  ;;  %207 = vmatpush.msra.mxu2 %v188_v37  ;;  %v180_v45 = vld [vmem:[%s2906_s3 + $0x180] sm:$0xff]  ;;  %v181_v46 = vld [vmem:[%s2906_s3 + $0x188] sm:$0xff]  ;;  %v182_v47 = vld [vmem:[%s2906_s3 + $0x190] sm:$0xff] }
  0x11   :  { %118 = vmatpush.msra.mxu1 %v1191_v17  ;;  %228 = vmatpush.msra.mxu3 %v185_v42  ;;  %v183_v48 = vld [vmem:[%s2906_s3 + $0x198] sm:$0xff]  ;;  %v176_v49 = vld [vmem:[%s2906_s3 + $0x160] sm:$0xff]  ;;  %v177_v50 = vld [vmem:[%s2906_s3 + $0x168] sm:$0xff] }
  0x12   :  { %76 = vmatpush.msra.mxu0 %v55_v14  ;;  %208 = vmatpush.msra.mxu2 %v184_v41  ;;  %v178_v51 = vld [vmem:[%s2906_s3 + $0x170] sm:$0xff]  ;;  %v179_v52 = vld [vmem:[%s2906_s3 + $0x178] sm:$0xff]  ;;  %v172_v53 = vld [vmem:[%s2906_s3 + $0x140] sm:$0xff] }
  0x13   :  { %119 = vmatpush.msra.mxu1 %v1190_v19  ;;  %229 = vmatpush.msra.mxu3 %v181_v46  ;;  %v173_v54 = vld [vmem:[%s2906_s3 + $0x148] sm:$0xff]  ;;  %v174_v55 = vld [vmem:[%s2906_s3 + $0x150] sm:$0xff]  ;;  %v175_v56 = vld [vmem:[%s2906_s3 + $0x158] sm:$0xff] }
  0x14   :  { %77 = vmatpush.msra.mxu0 %v54_v16  ;;  %209 = vmatpush.msra.mxu2 %v180_v45  ;;  %v168_v57 = vld [vmem:[%s2906_s3 + $0x120] sm:$0xff]  ;;  %v169_v58 = vld [vmem:[%s2906_s3 + $0x128] sm:$0xff]  ;;  %v170_v59 = vld [vmem:[%s2906_s3 + $0x130] sm:$0xff] }
  0x15   :  { %120 = vmatpush.msra.mxu1 %v1189_v21  ;;  %230 = vmatpush.msra.mxu3 %v177_v50  ;;  %v171_v60 = vld [vmem:[%s2906_s3 + $0x138] sm:$0xff]  ;;  %v164_v61 = vld [vmem:[%s2906_s3 + $0x100] sm:$0xff]  ;;  %v165_v62 = vld [vmem:[%s2906_s3 + $0x108] sm:$0xff] }
  0x16   :  { %78 = vmatpush.msra.mxu0 %v53_v18  ;;  %210 = vmatpush.msra.mxu2 %v176_v49  ;;  %v166_v63 = vld [vmem:[%s2906_s3 + $0x110] sm:$0xff]  ;;  %v167_v0 = vld [vmem:[%s2906_s3 + $0x118] sm:$0xff]  ;;  %v160_v1 = vld [vmem:[%s2906_s3 + $0xe0] sm:$0xff] }
  0x17   :  { %121 = vmatpush.msra.mxu1 %v1188_v23  ;;  %231 = vmatpush.msra.mxu3 %v173_v54  ;;  %v161_v2 = vld [vmem:[%s2906_s3 + $0xe8] sm:$0xff]  ;;  %v162_v3 = vld [vmem:[%s2906_s3 + $0xf0] sm:$0xff]  ;;  %v163_v4 = vld [vmem:[%s2906_s3 + $0xf8] sm:$0xff] }
  0x18   :  { %79 = vmatpush.msra.mxu0 %v52_v20  ;;  %211 = vmatpush.msra.mxu2 %v172_v53  ;;  %v156_v5 = vld [vmem:[%s2906_s3 + $0xc0] sm:$0xff]  ;;  %v157_v6 = vld [vmem:[%s2906_s3 + $0xc8] sm:$0xff]  ;;  %v158_v7 = vld [vmem:[%s2906_s3 + $0xd0] sm:$0xff] }
  0x19   :  { %122 = vmatpush.msra.mxu1 %v1187_v25  ;;  %232 = vmatpush.msra.mxu3 %v169_v58  ;;  %v159_v8 = vld [vmem:[%s2906_s3 + $0xd8] sm:$0xff]  ;;  %v152_v9 = vld [vmem:[%s2906_s3 + $0xa0] sm:$0xff]  ;;  %v153_v10 = vld [vmem:[%s2906_s3 + $0xa8] sm:$0xff] }
  0x1a   :  { %80 = vmatpush.msra.mxu0 %v51_v22  ;;  %212 = vmatpush.msra.mxu2 %v168_v57  ;;  %v154_v11 = vld [vmem:[%s2906_s3 + $0xb0] sm:$0xff]  ;;  %v155_v12 = vld [vmem:[%s2906_s3 + $0xb8] sm:$0xff]  ;;  %v148_v13 = vld [vmem:[%s2906_s3 + $0x80] sm:$0xff] }
  0x1b   :  { %123 = vmatpush.msra.mxu1 %v1186_v27  ;;  %233 = vmatpush.msra.mxu3 %v165_v62  ;;  %v149_v14 = vld [vmem:[%s2906_s3 + $0x88] sm:$0xff]  ;;  %v150_v15 = vld [vmem:[%s2906_s3 + $0x90] sm:$0xff]  ;;  %v151_v16 = vld [vmem:[%s2906_s3 + $0x98] sm:$0xff] }
  0x1c   :  { %81 = vmatpush.msra.mxu0 %v50_v24  ;;  %213 = vmatpush.msra.mxu2 %v164_v61  ;;  %v144_v17 = vld [vmem:[%s2906_s3 + $0x60] sm:$0xff]  ;;  %v145_v18 = vld [vmem:[%s2906_s3 + $0x68] sm:$0xff]  ;;  %v146_v19 = vld [vmem:[%s2906_s3 + $0x70] sm:$0xff] }
  0x1d   :  { %124 = vmatpush.msra.mxu1 %v1185_v30  ;;  %234 = vmatpush.msra.mxu3 %v161_v2  ;;  %v147_v20 = vld [vmem:[%s2906_s3 + $0x78] sm:$0xff]  ;;  %v1364_v21 = vld [vmem:[%s2904_s2] ss:$0 sm:$0xff]  ;;  %v142_v27 = vld [vmem:[%s2906_s3 + $0x50] sm:$0xff] }
  0x1e   :  { %82 = vmatpush.msra.mxu0 %v49_v26  ;;  %214 = vmatpush.msra.mxu2 %v160_v1  ;;  %v140_v25 = vld [vmem:[%s2906_s3 + $0x40] sm:$0xff]  ;;  %v141_v26 = vld [vmem:[%s2906_s3 + $0x48] sm:$0xff]  ;;  %v301_v37 = vld [vmem:[%s2907_s5 + $0x78] sm:$0xff] }
  0x1f   :  { %125 = vmatpush.msra.mxu1 %v1184_v31  ;;  %235 = vmatpush.msra.mxu3 %v157_v6  ;;  %v137_v30 = vld [vmem:[%s2906_s3 + $0x28] sm:$0xff]  ;;  %v138_v31 = vld [vmem:[%s2906_s3 + $0x30] sm:$0xff]  ;;  %v132_v33 = vld [vmem:[%s2906_s3] sm:$0xff] }
  0x20   :  { %83 = vmatpush.msra.mxu0 %v48_v28  ;;  %215 = vmatpush.msra.mxu2 %v156_v5  ;;  %v143_v28 = vld [vmem:[%s2906_s3 + $0x58] sm:$0xff]  ;;  %v133_v34 = vld [vmem:[%s2906_s3 + $0x8] sm:$0xff]  ;;  %v300_v38 = vld [vmem:[%s2907_s5 + $0x70] sm:$0xff] }
  0x21   :  { %84 = vmatmul.f32.vlgmr.msra.gmra.mxu0 %v47_v29  ;;  %126 = vmatpush.msra.mxu1 %v1183_v32  ;;  %v136_v29 = vld [vmem:[%s2906_s3 + $0x20] sm:$0xff]  ;;  %v139_v32 = vld [vmem:[%s2906_s3 + $0x38] sm:$0xff]  ;;  %v331_v45 = vld [vmem:[%s2907_s5 + $0x168] sm:$0xff] }
  0x22   :  { %246 = vmatpush.msrb.mxu0 %v194_v35  ;;  %216 = vmatpush.msra.mxu2 %v152_v9  ;;  %v134_v35 = vld [vmem:[%s2906_s3 + $0x10] sm:$0xff]  ;;  %v349_v41 = vld [vmem:[%s2907_s5 + $0x1f8] sm:$0xff]  ;;  %v298_v42 = vld [vmem:[%s2907_s5 + $0x60] sm:$0xff] }
  0x23   :  { %266 = vmatpush.msrb.mxu1 %v195_v36  ;;  %236 = vmatpush.msra.mxu3 %v153_v10  ;;  %v135_v36 = vld [vmem:[%s2906_s3 + $0x18] sm:$0xff]  ;;  %v347_v46 = vld [vmem:[%s2907_s5 + $0x1e8] sm:$0xff]  ;;  %v330_v49 = vld [vmem:[%s2907_s5 + $0x160] sm:$0xff] }
  0x24   :  { %247 = vmatpush.msrb.mxu0 %v190_v39  ;;  %217 = vmatpush.msra.mxu2 %v148_v13  ;;  %v299_v39 = vld [vmem:[%s2907_s5 + $0x68] sm:$0xff]  ;;  %v346_v50 = vld [vmem:[%s2907_s5 + $0x1e0] sm:$0xff]  ;;  %v329_v54 = vld [vmem:[%s2907_s5 + $0x158] sm:$0xff] }
  0x25   :  { %267 = vmatpush.msrb.mxu1 %v191_v40  ;;  %237 = vmatpush.msra.mxu3 %v149_v14  ;;  %v333_v40 = vld [vmem:[%s2907_s5 + $0x178] sm:$0xff]  ;;  %v315_v53 = vld [vmem:[%s2907_s5 + $0xe8] sm:$0xff]  ;;  %v314_v57 = vld [vmem:[%s2907_s5 + $0xe0] sm:$0xff] }
  0x26   :  { %248 = vmatpush.msrb.mxu0 %v186_v43  ;;  %218 = vmatpush.msra.mxu2 %v144_v17  ;;  %v332_v43 = vld [vmem:[%s2907_s5 + $0x170] sm:$0xff]  ;;  %v313_v61 = vld [vmem:[%s2907_s5 + $0xd8] sm:$0xff]  ;;  %v327_v62 = vld [vmem:[%s2907_s5 + $0x148] sm:$0xff] }
  0x27   :  { %268 = vmatpush.msrb.mxu1 %v187_v44  ;;  %238 = vmatpush.msra.mxu3 %v145_v18  ;;  %v348_v44 = vld [vmem:[%s2907_s5 + $0x1f0] sm:$0xff]  ;;  %v326_v2 = vld [vmem:[%s2907_s5 + $0x140] sm:$0xff]  ;;  %v311_v5 = vld [vmem:[%s2907_s5 + $0xc8] sm:$0xff] }
  0x28   :  { %249 = vmatpush.msrb.mxu0 %v182_v47  ;;  %219 = vmatpush.msra.mxu2 %v140_v25  ;;  %v297_v47 = vld [vmem:[%s2907_s5 + $0x58] sm:$0xff]  ;;  %v328_v58 = vld [vmem:[%s2907_s5 + $0x150] sm:$0xff]  ;;  %v310_v9 = vld [vmem:[%s2907_s5 + $0xc0] sm:$0xff] }
  0x29   :  { %269 = vmatpush.msrb.mxu1 %v183_v48  ;;  %239 = vmatpush.msra.mxu3 %v141_v26  ;;  %v317_v48 = vld [vmem:[%s2907_s5 + $0xf8] sm:$0xff]  ;;  %v312_v1 = vld [vmem:[%s2907_s5 + $0xd0] sm:$0xff]  ;;  %v323_v14 = vld [vmem:[%s2907_s5 + $0x128] sm:$0xff] }
  0x2a   :  { %250 = vmatpush.msrb.mxu0 %v178_v51  ;;  %220 = vmatpush.msra.mxu2 %v136_v29  ;;  %v316_v51 = vld [vmem:[%s2907_s5 + $0xf0] sm:$0xff]  ;;  %v325_v6 = vld [vmem:[%s2907_s5 + $0x138] sm:$0xff]  ;;  %v1365_v18 = vld [vmem:[%s2904_s2 + $0x1] ss:$0 sm:$0xff] }
  0x2b   :  { %270 = vmatpush.msrb.mxu1 %v179_v52  ;;  %240 = vmatpush.msra.mxu3 %v137_v30  ;;  %v296_v52 = vld [vmem:[%s2907_s5 + $0x50] sm:$0xff]  ;;  %v309_v13 = vld [vmem:[%s2907_s5 + $0xb8] sm:$0xff]  ;;  %v287_v26 = vld [vmem:[%s2907_s5 + $0x8] sm:$0xff] }
  0x2c   :  { %251 = vmatpush.msrb.mxu0 %v174_v55  ;;  %221 = vmatpush.msra.mxu2 %v132_v33  ;;  %v345_v55 = vld [vmem:[%s2907_s5 + $0x1d8] sm:$0xff]  ;;  %v324_v10 = vld [vmem:[%s2907_s5 + $0x130] sm:$0xff] }
  0x2d   :  { %271 = vmatpush.msrb.mxu1 %v175_v56  ;;  %241 = vmatpush.msra.mxu3 %v133_v34  ;;  %v295_v56 = vld [vmem:[%s2907_s5 + $0x48] sm:$0xff]  ;;  %v308_v17 = vld [vmem:[%s2907_s5 + $0xb0] sm:$0xff] }
  0x2e   :  { %252 = vmatpush.msrb.mxu0 %v170_v59  ;;  %354 = vmatpush.msrb.mxu2 %v301_v37  ;;  %v344_v59 = vld [vmem:[%s2907_s5 + $0x1d0] sm:$0xff]  ;;  %v1213_v34 = vld [vmem:[%s2903_s1 + $0x168] sm:$0xff] }
  0x2f   :  { %272 = vmatpush.msrb.mxu1 %v171_v60  ;;  %374 = vmatpush.msrb.mxu3 %v317_v48  ;;  %v294_v60 = vld [vmem:[%s2907_s5 + $0x40] sm:$0xff]  ;;  %v336_v29 = vld [vmem:[%s2907_s5 + $0x190] sm:$0xff] }
  0x30   :  { %253 = vmatpush.msrb.mxu0 %v166_v63  ;;  %355 = vmatpush.msrb.mxu2 %v300_v38  ;;  %v343_v63 = vld [vmem:[%s2907_s5 + $0x1c8] sm:$0xff]  ;;  %v1214_v33 = vld [vmem:[%s2903_s1 + $0x170] sm:$0xff] }
  0x31   :  { %273 = vmatpush.msrb.mxu1 %v167_v0  ;;  %375 = vmatpush.msrb.mxu3 %v316_v51  ;;  %v293_v0 = vld [vmem:[%s2907_s5 + $0x38] sm:$0xff]  ;;  %v1210_v37 = vld [vmem:[%s2903_s1 + $0x150] sm:$0xff]  ;;  %v1209_v38 = vld [vmem:[%s2903_s1 + $0x148] sm:$0xff] }
  0x32   :  { %254 = vmatpush.msrb.mxu0 %v162_v3  ;;  %356 = vmatpush.msrb.mxu2 %v299_v39  ;;  %v342_v3 = vld [vmem:[%s2907_s5 + $0x1c0] sm:$0xff]  ;;  %v1206_v48 = vld [vmem:[%s2903_s1 + $0x130] sm:$0xff] }
  0x33   :  { %274 = vmatpush.msrb.mxu1 %v163_v4  ;;  %376 = vmatpush.msrb.mxu3 %v315_v53  ;;  %v292_v4 = vld [vmem:[%s2907_s5 + $0x30] sm:$0xff]  ;;  %v306_v39 = vld [vmem:[%s2907_s5 + $0xa0] sm:$0xff]  ;;  %v1203_v53 = vld [vmem:[%s2903_s1 + $0x118] sm:$0xff] }
  0x34   :  { %255 = vmatpush.msrb.mxu0 %v158_v7  ;;  %357 = vmatpush.msrb.mxu2 %v298_v42  ;;  %v341_v7 = vld [vmem:[%s2907_s5 + $0x1b8] sm:$0xff]  ;;  %v1208_v42 = vld [vmem:[%s2903_s1 + $0x140] sm:$0xff] }
  0x35   :  { %275 = vmatpush.msrb.mxu1 %v159_v8  ;;  %377 = vmatpush.msrb.mxu3 %v314_v57  ;;  %v291_v8 = vld [vmem:[%s2907_s5 + $0x28] sm:$0xff]  ;;  %v302_v51 = vld [vmem:[%s2907_s5 + $0x80] sm:$0xff]  ;;  %v1232_v57 = vld [vmem:[%s2903_s1 + $0x1f8] sm:$0xff] }
  0x36   :  { %256 = vmatpush.msrb.mxu0 %v154_v11  ;;  %358 = vmatpush.msrb.mxu2 %v297_v47  ;;  %v340_v11 = vld [vmem:[%s2907_s5 + $0x1b0] sm:$0xff] }
  0x37   :  { %276 = vmatpush.msrb.mxu1 %v155_v12  ;;  %378 = vmatpush.msrb.mxu3 %v313_v61  ;;  %v290_v12 = vld [vmem:[%s2907_s5 + $0x20] sm:$0xff]  ;;  %v304_v47 = vld [vmem:[%s2907_s5 + $0x90] sm:$0xff] }
  0x38   :  { %257 = vmatpush.msrb.mxu0 %v150_v15  ;;  %359 = vmatpush.msrb.mxu2 %v296_v52  ;;  %v339_v15 = vld [vmem:[%s2907_s5 + $0x1a8] sm:$0xff]  ;;  %v1204_v52 = vld [vmem:[%s2903_s1 + $0x120] sm:$0xff] }
  0x39   :  { %277 = vmatpush.msrb.mxu1 %v151_v16  ;;  %379 = vmatpush.msrb.mxu3 %v312_v1  ;;  %v289_v16 = vld [vmem:[%s2907_s5 + $0x18] sm:$0xff] }
  0x3a   :  { %258 = vmatpush.msrb.mxu0 %v146_v19  ;;  %360 = vmatpush.msrb.mxu2 %v295_v56  ;;  %v322_v19 = vld [vmem:[%s2907_s5 + $0x120] sm:$0xff] }
  0x3b   :  { %278 = vmatpush.msrb.mxu1 %v147_v20  ;;  %380 = vmatpush.msrb.mxu3 %v311_v5  ;;  %v338_v20 = vld [vmem:[%s2907_s5 + $0x1a0] sm:$0xff] }
  0x3c   :  { %259 = vmatpush.msrb.mxu0 %v142_v27  ;;  %361 = vmatpush.msrb.mxu2 %v294_v60  ;;  %v1200_v56 = vld [vmem:[%s2903_s1 + $0x100] sm:$0xff] }
  0x3d   :  { %279 = vmatpush.msrb.mxu1 %v143_v28  ;;  %381 = vmatpush.msrb.mxu3 %v310_v9  ;;  %v320_v28 = vld [vmem:[%s2907_s5 + $0x110] sm:$0xff]  ;;  %v196_v60 = vld [vmem:[%s2908_s4] sm:$0xf] }
  0x3e   :  { %260 = vmatpush.msrb.mxu0 %v138_v31  ;;  %362 = vmatpush.msrb.mxu2 %v293_v0  ;;  %v286_v31 = vld [vmem:[%s2907_s5] sm:$0xff]  ;;  %v200_v61 = vperm.slane %v196_v60, 2 }
  0x3f   :  { %280 = vmatpush.msrb.mxu1 %v139_v32  ;;  %382 = vmatpush.msrb.mxu3 %v309_v13  ;;  %v1215_v32 = vld [vmem:[%s2903_s1 + $0x178] sm:$0xff]  ;;  %v1229_v9 = vld [vmem:[%s2903_s1 + $0x1e0] sm:$0xff] }
  0x40   :  { %261 = vmatpush.msrb.mxu0 %v134_v35  ;;  %363 = vmatpush.msrb.mxu2 %v292_v4  ;;  %v1212_v35 = vld [vmem:[%s2903_s1 + $0x160] sm:$0xff]  ;;  %v199_v4 = vperm.slane %v196_v60, 1 }
  0x41   :  { %281 = vmatpush.msrb.mxu1 %v135_v36  ;;  %383 = vmatpush.msrb.mxu3 %v308_v17  ;;  %v1211_v36 = vld [vmem:[%s2903_s1 + $0x158] sm:$0xff]  ;;  %v1225_v13 = vld [vmem:[%s2903_s1 + $0x1c0] sm:$0xff] }
  0x42   :  { %394 = vmatpush.msra.mxu0 %v333_v40  ;;  %364 = vmatpush.msrb.mxu2 %v291_v8  ;;  %v319_v40 = vld [vmem:[%s2907_s5 + $0x108] sm:$0xff]  ;;  %v1221_v17 = vld [vmem:[%s2903_s1 + $0x1a0] sm:$0xff] }
  0x44   :  { %395 = vmatpush.msra.mxu0 %v332_v43  ;;  %365 = vmatpush.msrb.mxu2 %v290_v12  ;;  %v305_v43 = vld [vmem:[%s2907_s5 + $0x98] sm:$0xff]  ;;  %v1226_v12 = vld [vmem:[%s2903_s1 + $0x1c8] sm:$0xff] }
  0x46   :  { %396 = vmatpush.msra.mxu0 %v331_v45  ;;  %366 = vmatpush.msrb.mxu2 %v289_v16  ;;  %v334_v45 = vld [vmem:[%s2907_s5 + $0x180] sm:$0xff]  ;;  %v1222_v16 = vld [vmem:[%s2903_s1 + $0x1a8] sm:$0xff] }
  0x48   :  { %397 = vmatpush.msra.mxu0 %v330_v49  ;;  %v303_v49 = vld [vmem:[%s2907_s5 + $0x88] sm:$0xff] }
  0x4a   :  { %398 = vmatpush.msra.mxu0 %v329_v54  ;;  %v1202_v54 = vld [vmem:[%s2903_s1 + $0x110] sm:$0xff] }
  0x4c   :  { %399 = vmatpush.msra.mxu0 %v328_v58  ;;  %v1231_v58 = vld [vmem:[%s2903_s1 + $0x1f0] sm:$0xff] }
  0x4e   :  { %400 = vmatpush.msra.mxu0 %v327_v62  ;;  %v201_v62 = vperm.slane %v196_v60, 3 }
  0x50   :  { %401 = vmatpush.msra.mxu0 %v326_v2 }
  0x52   :  { %402 = vmatpush.msra.mxu0 %v325_v6 }
  0x54   :  { %403 = vmatpush.msra.mxu0 %v324_v10  ;;  %v1228_v10 = vld [vmem:[%s2903_s1 + $0x1d8] sm:$0xff] }
  0x56   :  { %404 = vmatpush.msra.mxu0 %v323_v14  ;;  %v1224_v14 = vld [vmem:[%s2903_s1 + $0x1b8] sm:$0xff] }
  0x58   :  { %405 = vmatpush.msra.mxu0 %v322_v19  ;;  %v1219_v19 = vld [vmem:[%s2903_s1 + $0x190] sm:$0xff] }
  0x9e   :  { %v85_v22 = vpop.f32.mrf.mxu0 }
  0x9f   :  { %v86_v23 = vadd.f32 %v1364_v21, %v85_v22  ;;  %v288_v21 = vld [vmem:[%s2907_s5 + $0x10] sm:$0xff]  ;;  %v307_v22 = vld [vmem:[%s2907_s5 + $0xa8] sm:$0xff] }
  0xa0   :  { %367 = vmatpush.msrb.mxu2 %v288_v21  ;;  %384 = vmatpush.msrb.mxu3 %v307_v22  ;;  %v1217_v21 = vld [vmem:[%s2903_s1 + $0x180] sm:$0xff] }
  0xa1   :  { %v88_v24 = vmax.f32 %v86_v23, 0.0  ;;  %v321_v23 = vld [vmem:[%s2907_s5 + $0x118] sm:$0xff]  ;;  %v1294_v22 = vld [vmem:[%s2906_s3 + $0x3e0] sm:$0xff] }
  0xa2   :  { %406 = vmatpush.msra.mxu0 %v321_v23  ;;  %368 = vmatpush.msrb.mxu2 %v287_v26  ;;  %v1295_v23 = vld [vmem:[%s2906_s3 + $0x3e8] sm:$0xff]  ;;  %v1290_v26 = vld [vmem:[%s2906_s3 + $0x3c0] sm:$0xff] }
  0xa3   :  { %127 = vmatmul.f32.vlgmr.msra.gmra.mxu1 %v88_v24  ;;  %v337_v24 = vld [vmem:[%s2907_s5 + $0x198] sm:$0xff]  ;;  %385 = vmatpush.msrb.mxu3 %v306_v39  ;;  %v1279_v39 = vld [vmem:[%s2906_s3 + $0x368] sm:$0xff] }
  0xa4   :  { %414 = vmatpush.msra.mxu1 %v349_v41  ;;  %407 = vmatpush.msra.mxu0 %v320_v28  ;;  %v335_v41 = vld [vmem:[%s2907_s5 + $0x188] sm:$0xff]  ;;  %v1292_v28 = vld [vmem:[%s2906_s3 + $0x3d0] sm:$0xff] }
  0xa5   :  { %369 = vmatpush.msrb.mxu2 %v286_v31  ;;  %386 = vmatpush.msrb.mxu3 %v305_v43  ;;  %v1287_v31 = vld [vmem:[%s2906_s3 + $0x3a8] sm:$0xff] }
  0xa6   :  { %415 = vmatpush.msra.mxu1 %v348_v44  ;;  %408 = vmatpush.msra.mxu0 %v319_v40  ;;  %v318_v44 = vld [vmem:[%s2907_s5 + $0x100] sm:$0xff]  ;;  %v1280_v40 = vld [vmem:[%s2906_s3 + $0x370] sm:$0xff]  ;;  %v1275_v43 = vld [vmem:[%s2906_s3 + $0x348] sm:$0xff] }
  0xa7   :  { %387 = vmatpush.msrb.mxu3 %v304_v47  ;;  %v1271_v47 = vld [vmem:[%s2906_s3 + $0x328] sm:$0xff] }
  0xa8   :  { %416 = vmatpush.msra.mxu1 %v347_v46  ;;  %409 = vmatpush.msra.mxu0 %v318_v44  ;;  %v1207_v46 = vld [vmem:[%s2903_s1 + $0x138] sm:$0xff]  ;;  %v1276_v44 = vld [vmem:[%s2906_s3 + $0x350] sm:$0xff] }
  0xa9   :  { %388 = vmatpush.msrb.mxu3 %v303_v49  ;;  %v1273_v49 = vld [vmem:[%s2906_s3 + $0x338] sm:$0xff] }
  0xaa   :  { %417 = vmatpush.msra.mxu1 %v346_v50  ;;  %v1205_v50 = vld [vmem:[%s2903_s1 + $0x128] sm:$0xff] }
  0xab   :  { %389 = vmatpush.msrb.mxu3 %v302_v51  ;;  %v1267_v51 = vld [vmem:[%s2906_s3 + $0x308] sm:$0xff] }
  0xac   :  { %418 = vmatpush.msra.mxu1 %v345_v55  ;;  %v1201_v55 = vld [vmem:[%s2903_s1 + $0x108] sm:$0xff] }
  0xae   :  { %419 = vmatpush.msra.mxu1 %v344_v59  ;;  %v1230_v59 = vld [vmem:[%s2903_s1 + $0x1e8] sm:$0xff] }
  0xb0   :  { %420 = vmatpush.msra.mxu1 %v343_v63 }
  0xb2   :  { %421 = vmatpush.msra.mxu1 %v342_v3  ;;  %v198_v3 = vperm.slane %v196_v60, 0  ;;  %v1259_v60 = vld [vmem:[%s2906_s3 + $0x2c8] sm:$0xff] }
  0xb4   :  { %422 = vmatpush.msra.mxu1 %v341_v7 }
  0xb6   :  { %423 = vmatpush.msra.mxu1 %v340_v11  ;;  %v1227_v11 = vld [vmem:[%s2903_s1 + $0x1d0] sm:$0xff] }
  0xb8   :  { %424 = vmatpush.msra.mxu1 %v339_v15  ;;  %v1223_v15 = vld [vmem:[%s2903_s1 + $0x1b0] sm:$0xff] }
  0xba   :  { %425 = vmatpush.msra.mxu1 %v338_v20  ;;  %v1218_v20 = vld [vmem:[%s2903_s1 + $0x188] sm:$0xff] }
  0xbc   :  { %426 = vmatpush.msra.mxu1 %v337_v24  ;;  %v1296_v24 = vld [vmem:[%s2906_s3 + $0x3f0] sm:$0xff] }
  0xbe   :  { %427 = vmatpush.msra.mxu1 %v336_v29  ;;  %v1293_v29 = vld [vmem:[%s2906_s3 + $0x3d8] sm:$0xff] }
  0xc0   :  { %428 = vmatpush.msra.mxu1 %v335_v41  ;;  %v1281_v41 = vld [vmem:[%s2906_s3 + $0x378] sm:$0xff] }
  0xc2   :  { %429 = vmatpush.msra.mxu1 %v334_v45  ;;  %v1277_v45 = vld [vmem:[%s2906_s3 + $0x358] sm:$0xff] }
 0x120   :  { %v128_v25 = vpop.f32.mrf.mxu1 }
 0x121   :  { %v129_v27 = vadd.f32 %v1365_v18, %v128_v25  ;;  %v1220_v18 = vld [vmem:[%s2903_s1 + $0x198] sm:$0xff] }
 0x122   :  { %v1297_v25 = vld [vmem:[%s2906_s3 + $0x3f8] sm:$0xff] }
 0x123   :  { %v1911_v30 = vmax.f32 %v129_v27, 0.0  ;;  %v1291_v27 = vld [vmem:[%s2906_s3 + $0x3c8] sm:$0xff] }
 0x125   :  { %222 = vmatmul.f32.vlgmr.msra.gmra.mxu2 %v1911_v30  ;;  %242 = vmatmul.f32.vlgmr.msra.gmra.mxu3 %v1911_v30 }
 0x126   :  { %262 = vmatmul.f32.vlgmr.msrb.gmra.mxu0 %v1911_v30  ;;  %282 = vmatmul.f32.vlgmr.msrb.gmra.mxu1 %v1911_v30 }
 0x127   :  { %457 = vmatpush.msra.mxu2 %v1215_v32  ;;  %500 = vmatpush.msra.mxu3 %v1232_v57  ;;  %v1288_v32 = vld [vmem:[%s2906_s3 + $0x3b0] sm:$0xff]  ;;  %v1265_v57 = vld [vmem:[%s2906_s3 + $0x2f8] sm:$0xff] }
 0x128   :  { %597 = vmatpush.msrb.mxu0 %v1294_v22  ;;  %617 = vmatpush.msrb.mxu1 %v1295_v23  ;;  %v1242_v23 = vld [vmem:[%s2906_s3 + $0x240] sm:$0xff] }
 0x129   :  { %458 = vmatpush.msra.mxu2 %v1214_v33  ;;  %501 = vmatpush.msra.mxu3 %v1231_v58  ;;  %v1289_v33 = vld [vmem:[%s2906_s3 + $0x3b8] sm:$0xff]  ;;  %v1366_v58 = vld [vmem:[%s2909_s6] ss:$0 sm:$0xff] }
 0x12a   :  { %598 = vmatpush.msrb.mxu0 %v1290_v26  ;;  %618 = vmatpush.msrb.mxu1 %v1291_v27  ;;  %v1245_v26 = vld [vmem:[%s2906_s3 + $0x258] sm:$0xff]  ;;  %v1238_v27 = vld [vmem:[%s2906_s3 + $0x220] sm:$0xff] }
 0x12b   :  { %459 = vmatpush.msra.mxu2 %v1213_v34  ;;  %502 = vmatpush.msra.mxu3 %v1230_v59  ;;  %v1282_v34 = vld [vmem:[%s2906_s3 + $0x380] sm:$0xff] }
 0x12c   :  { %619 = vmatpush.msrb.mxu1 %v1287_v31  ;;  %v1258_v59 = vld [vmem:[%s2906_s3 + $0x2c0] sm:$0xff] }
 0x12d   :  { %460 = vmatpush.msra.mxu2 %v1212_v35  ;;  %503 = vmatpush.msra.mxu3 %v1229_v9  ;;  %v1283_v35 = vld [vmem:[%s2906_s3 + $0x388] sm:$0xff]  ;;  %v1253_v9 = vld [vmem:[%s2906_s3 + $0x298] sm:$0xff]  ;;  %v1234_v31 = vld [vmem:[%s2906_s3 + $0x200] sm:$0xff] }
 0x12e   :  { %620 = vmatpush.msrb.mxu1 %v1283_v35  ;;  %v1314_v35 = vld [vmem:[%s2907_s5 + $0x278] sm:$0xff] }
 0x12f   :  { %461 = vmatpush.msra.mxu2 %v1211_v36  ;;  %504 = vmatpush.msra.mxu3 %v1228_v10  ;;  %v1284_v36 = vld [vmem:[%s2906_s3 + $0x390] sm:$0xff] }
 0x130   :  { %621 = vmatpush.msrb.mxu1 %v1279_v39  ;;  %v1330_v39 = vld [vmem:[%s2907_s5 + $0x2f8] sm:$0xff] }
 0x131   :  { %462 = vmatpush.msra.mxu2 %v1210_v37  ;;  %505 = vmatpush.msra.mxu3 %v1227_v11  ;;  %v1285_v37 = vld [vmem:[%s2906_s3 + $0x398] sm:$0xff]  ;;  %v1246_v11 = vld [vmem:[%s2906_s3 + $0x260] sm:$0xff] }
 0x132   :  { %622 = vmatpush.msrb.mxu1 %v1275_v43  ;;  %v1346_v43 = vld [vmem:[%s2907_s5 + $0x378] sm:$0xff] }
 0x133   :  { %463 = vmatpush.msra.mxu2 %v1209_v38  ;;  %506 = vmatpush.msra.mxu3 %v1226_v12  ;;  %v1278_v38 = vld [vmem:[%s2906_s3 + $0x360] sm:$0xff]  ;;  %v1247_v12 = vld [vmem:[%s2906_s3 + $0x268] sm:$0xff] }
 0x134   :  { %623 = vmatpush.msrb.mxu1 %v1271_v47  ;;  %v1327_v47 = vld [vmem:[%s2907_s5 + $0x2e0] sm:$0xff] }
 0x135   :  { %464 = vmatpush.msra.mxu2 %v1208_v42  ;;  %507 = vmatpush.msra.mxu3 %v1225_v13  ;;  %v1274_v42 = vld [vmem:[%s2906_s3 + $0x340] sm:$0xff] }
 0x136   :  { %624 = vmatpush.msrb.mxu1 %v1267_v51  ;;  %v1308_v51 = vld [vmem:[%s2907_s5 + $0x248] sm:$0xff] }
 0x137   :  { %465 = vmatpush.msra.mxu2 %v1207_v46  ;;  %508 = vmatpush.msra.mxu3 %v1224_v14  ;;  %v1270_v46 = vld [vmem:[%s2906_s3 + $0x320] sm:$0xff]  ;;  %v1248_v14 = vld [vmem:[%s2906_s3 + $0x270] sm:$0xff] }
 0x139   :  { %466 = vmatpush.msra.mxu2 %v1206_v48  ;;  %509 = vmatpush.msra.mxu3 %v1223_v15  ;;  %v1272_v48 = vld [vmem:[%s2906_s3 + $0x330] sm:$0xff]  ;;  %v1249_v15 = vld [vmem:[%s2906_s3 + $0x278] sm:$0xff] }
 0x13b   :  { %467 = vmatpush.msra.mxu2 %v1205_v50  ;;  %510 = vmatpush.msra.mxu3 %v1222_v16  ;;  %v1266_v50 = vld [vmem:[%s2906_s3 + $0x300] sm:$0xff] }
 0x13d   :  { %468 = vmatpush.msra.mxu2 %v1204_v52  ;;  %511 = vmatpush.msra.mxu3 %v1221_v17  ;;  %v1268_v52 = vld [vmem:[%s2906_s3 + $0x310] sm:$0xff]  ;;  %v1367_v17 = vld [vmem:[%s2904_s2 + $0x2] ss:$0 sm:$0xff] }
 0x13f   :  { %469 = vmatpush.msra.mxu2 %v1203_v53  ;;  %512 = vmatpush.msra.mxu3 %v1220_v18  ;;  %v1269_v53 = vld [vmem:[%s2906_s3 + $0x318] sm:$0xff] }
 0x141   :  { %470 = vmatpush.msra.mxu2 %v1202_v54  ;;  %513 = vmatpush.msra.mxu3 %v1219_v19  ;;  %v1262_v54 = vld [vmem:[%s2906_s3 + $0x2e0] sm:$0xff] }
 0x143   :  { %471 = vmatpush.msra.mxu2 %v1201_v55  ;;  %514 = vmatpush.msra.mxu3 %v1218_v20  ;;  %v1263_v55 = vld [vmem:[%s2906_s3 + $0x2e8] sm:$0xff] }
 0x144   :  { %625 = vmatpush.msrb.mxu1 %v1263_v55  ;;  %v1307_v55 = vld [vmem:[%s2907_s5 + $0x240] sm:$0xff] }
 0x145   :  { %472 = vmatpush.msra.mxu2 %v1200_v56  ;;  %515 = vmatpush.msra.mxu3 %v1217_v21  ;;  %v1264_v56 = vld [vmem:[%s2906_s3 + $0x2f0] sm:$0xff] }
 0x146   :  { %626 = vmatpush.msrb.mxu1 %v1259_v60  ;;  %v1324_v60 = vld [vmem:[%s2907_s5 + $0x2c8] sm:$0xff] }
 0x1a3   :  { %v263_v63 = vpop.f32.mrf.mxu0  ;;  %v283_v0 = vpop.f32.mrf.mxu1 }
 0x1a4   :  { %v264_v1 = vadd.f32 %v263_v63, %v200_v61  ;;  %v284_v2 = vadd.f32 %v283_v0, %v201_v62  ;;  %v1260_v61 = vld [vmem:[%s2906_s3 + $0x2d0] sm:$0xff]  ;;  %v1261_v62 = vld [vmem:[%s2906_s3 + $0x2d8] sm:$0xff]  ;;  %v1254_v63 = vld [vmem:[%s2906_s3 + $0x2a0] sm:$0xff] }
 0x1a5   :  { %v1255_v0 = vld [vmem:[%s2906_s3 + $0x2a8] sm:$0xff] }
 0x1a6   :  { %410 = vmatmul.f32.vlgmr.msra.gmra.mxu0 %v264_v1  ;;  %430 = vmatmul.f32.vlgmr.msra.gmra.mxu1 %v284_v2  ;;  %v1256_v2 = vld [vmem:[%s2906_s3 + $0x2b0] sm:$0xff] }
 0x1a7   :  { %627 = vmatpush.msrb.mxu1 %v1255_v0  ;;  %v1323_v0 = vld [vmem:[%s2907_s5 + $0x2c0] sm:$0xff] }
 0x1a8   :  { %v223_v5 = vpop.f32.mrf.mxu2  ;;  %v243_v6 = vpop.f32.mrf.mxu3 }
 0x1a9   :  { %v224_v7 = vadd.f32 %v223_v5, %v198_v3  ;;  %v244_v8 = vadd.f32 %v243_v6, %v199_v4  ;;  %v1257_v3 = vld [vmem:[%s2906_s3 + $0x2b8] sm:$0xff]  ;;  %v1250_v5 = vld [vmem:[%s2906_s3 + $0x280] sm:$0xff]  ;;  %v1251_v6 = vld [vmem:[%s2906_s3 + $0x288] sm:$0xff] }
 0x1aa   :  { %628 = vmatpush.msrb.mxu1 %v1251_v6  ;;  %v1355_v6 = vld [vmem:[%s2907_s5 + $0x3c0] sm:$0xff] }
 0x1ab   :  { %370 = vmatmul.f32.vlgmr.msrb.gmra.mxu2 %v224_v7  ;;  %390 = vmatmul.f32.vlgmr.msrb.gmra.mxu3 %v244_v8  ;;  %v1252_v8 = vld [vmem:[%s2906_s3 + $0x290] sm:$0xff] }
 0x1ac   :  { %637 = vmatpush.msrb.mxu2 %v1296_v24  ;;  %657 = vmatpush.msrb.mxu3 %v1297_v25  ;;  %v1243_v24 = vld [vmem:[%s2906_s3 + $0x248] sm:$0xff]  ;;  %v1244_v25 = vld [vmem:[%s2906_s3 + $0x250] sm:$0xff] }
 0x1ad   :  { %629 = vmatpush.msrb.mxu1 %v1247_v12  ;;  %v1320_v12 = vld [vmem:[%s2907_s5 + $0x2a8] sm:$0xff] }
 0x1ae   :  { %638 = vmatpush.msrb.mxu2 %v1292_v28  ;;  %658 = vmatpush.msrb.mxu3 %v1293_v29  ;;  %v1239_v28 = vld [vmem:[%s2906_s3 + $0x228] sm:$0xff]  ;;  %v1240_v29 = vld [vmem:[%s2906_s3 + $0x230] sm:$0xff] }
 0x1af   :  { %630 = vmatpush.msrb.mxu1 %v1243_v24 }
 0x1b0   :  { %639 = vmatpush.msrb.mxu2 %v1288_v32  ;;  %659 = vmatpush.msrb.mxu3 %v1289_v33  ;;  %v1235_v32 = vld [vmem:[%s2906_s3 + $0x208] sm:$0xff]  ;;  %v1236_v33 = vld [vmem:[%s2906_s3 + $0x210] sm:$0xff] }
 0x1b1   :  { %631 = vmatpush.msrb.mxu1 %v1239_v28  ;;  %v842_v28 = vld [vmem:[%s2911_s7 + $0x70] sm:$0xff] }
 0x1b2   :  { %640 = vmatpush.msrb.mxu2 %v1284_v36  ;;  %660 = vmatpush.msrb.mxu3 %v1285_v37  ;;  %v1313_v36 = vld [vmem:[%s2907_s5 + $0x270] sm:$0xff]  ;;  %v1312_v37 = vld [vmem:[%s2907_s5 + $0x268] sm:$0xff] }
 0x1b3   :  { %473 = vmatmul.f32.vlgmr.msra.gmra.mxu2 %v1911_v30  ;;  %v1286_v30 = vld [vmem:[%s2906_s3 + $0x3a0] sm:$0xff]  ;;  %632 = vmatpush.msrb.mxu1 %v1235_v32  ;;  %v838_v32 = vld [vmem:[%s2911_s7 + $0x50] sm:$0xff] }
 0x1b4   :  { %599 = vmatpush.msrb.mxu0 %v1286_v30  ;;  %641 = vmatpush.msrb.mxu2 %v1280_v40  ;;  %v1241_v30 = vld [vmem:[%s2906_s3 + $0x238] sm:$0xff]  ;;  %v1329_v40 = vld [vmem:[%s2907_s5 + $0x2f0] sm:$0xff] }
 0x1b5   :  { %661 = vmatpush.msrb.mxu3 %v1281_v41  ;;  %v1310_v41 = vld [vmem:[%s2907_s5 + $0x258] sm:$0xff]  ;;  %767 = vmatpush.msra.mxu1 %v1330_v39  ;;  %v1351_v39 = vld [vmem:[%s2907_s5 + $0x3a0] sm:$0xff] }
 0x1b6   :  { %600 = vmatpush.msrb.mxu0 %v1282_v34  ;;  %642 = vmatpush.msrb.mxu2 %v1276_v44  ;;  %v1237_v34 = vld [vmem:[%s2906_s3 + $0x218] sm:$0xff] }
 0x1b7   :  { %662 = vmatpush.msrb.mxu3 %v1277_v45  ;;  %v1362_v44 = vld [vmem:[%s2907_s5 + $0x3f8] sm:$0xff]  ;;  %768 = vmatpush.msra.mxu1 %v1329_v40  ;;  %v1345_v45 = vld [vmem:[%s2907_s5 + $0x370] sm:$0xff]  ;;  %v833_v40 = vld [vmem:[%s2911_s7 + $0x28] sm:$0xff] }
 0x1b8   :  { %601 = vmatpush.msrb.mxu0 %v1278_v38  ;;  %643 = vmatpush.msrb.mxu2 %v1272_v48  ;;  %v1311_v38 = vld [vmem:[%s2907_s5 + $0x260] sm:$0xff]  ;;  %v1361_v48 = vld [vmem:[%s2907_s5 + $0x3f0] sm:$0xff] }
 0x1b9   :  { %663 = vmatpush.msrb.mxu3 %v1273_v49  ;;  %v1344_v49 = vld [vmem:[%s2907_s5 + $0x368] sm:$0xff] }
 0x1ba   :  { %602 = vmatpush.msrb.mxu0 %v1274_v42  ;;  %644 = vmatpush.msrb.mxu2 %v1268_v52  ;;  %v1328_v42 = vld [vmem:[%s2907_s5 + $0x2e8] sm:$0xff]  ;;  %v1326_v52 = vld [vmem:[%s2907_s5 + $0x2d8] sm:$0xff] }
 0x1bb   :  { %664 = vmatpush.msrb.mxu3 %v1269_v53  ;;  %769 = vmatpush.msra.mxu1 %v1328_v42  ;;  %v1343_v53 = vld [vmem:[%s2907_s5 + $0x360] sm:$0xff]  ;;  %v1334_v42 = vld [vmem:[%s2907_s5 + $0x318] sm:$0xff] }
 0x1bc   :  { %603 = vmatpush.msrb.mxu0 %v1270_v46  ;;  %645 = vmatpush.msrb.mxu2 %v1264_v56  ;;  %v1309_v46 = vld [vmem:[%s2907_s5 + $0x250] sm:$0xff] }
 0x1bd   :  { %665 = vmatpush.msrb.mxu3 %v1265_v57  ;;  %770 = vmatpush.msra.mxu1 %v1327_v47  ;;  %v1325_v56 = vld [vmem:[%s2907_s5 + $0x2d0] sm:$0xff]  ;;  %v1342_v57 = vld [vmem:[%s2907_s5 + $0x358] sm:$0xff] }
 0x1be   :  { %604 = vmatpush.msrb.mxu0 %v1266_v50  ;;  %646 = vmatpush.msrb.mxu2 %v1260_v61  ;;  %v1360_v50 = vld [vmem:[%s2907_s5 + $0x3e8] sm:$0xff]  ;;  %v1341_v61 = vld [vmem:[%s2907_s5 + $0x350] sm:$0xff]  ;;  %v831_v47 = vld [vmem:[%s2911_s7 + $0x18] sm:$0xff] }
 0x1bf   :  { %666 = vmatpush.msrb.mxu3 %v1261_v62  ;;  %771 = vmatpush.msra.mxu1 %v1326_v52  ;;  %v1357_v62 = vld [vmem:[%s2907_s5 + $0x3d0] sm:$0xff]  ;;  %v1347_v52 = vld [vmem:[%s2907_s5 + $0x380] sm:$0xff] }
 0x1c0   :  { %605 = vmatpush.msrb.mxu0 %v1262_v54  ;;  %647 = vmatpush.msrb.mxu2 %v1256_v2  ;;  %v1359_v54 = vld [vmem:[%s2907_s5 + $0x3e0] sm:$0xff]  ;;  %v1356_v2 = vld [vmem:[%s2907_s5 + $0x3c8] sm:$0xff] }
 0x1c1   :  { %667 = vmatpush.msrb.mxu3 %v1257_v3  ;;  %772 = vmatpush.msra.mxu1 %v1325_v56  ;;  %v1304_v3 = vld [vmem:[%s2907_s5 + $0x228] sm:$0xff] }
 0x1c2   :  { %606 = vmatpush.msrb.mxu0 %v1258_v59  ;;  %648 = vmatpush.msrb.mxu2 %v1252_v8  ;;  %v1306_v59 = vld [vmem:[%s2907_s5 + $0x238] sm:$0xff]  ;;  %v1321_v8 = vld [vmem:[%s2907_s5 + $0x2b0] sm:$0xff]  ;;  %v929_v56 = vld [vmem:[%s2912_s9 + $0x1e8] sm:$0xff] }
 0x1c3   :  { %668 = vmatpush.msrb.mxu3 %v1253_v9  ;;  %773 = vmatpush.msra.mxu1 %v1324_v60  ;;  %v1338_v9 = vld [vmem:[%s2907_s5 + $0x338] sm:$0xff]  ;;  %v926_v60 = vld [vmem:[%s2912_s9 + $0x1d0] sm:$0xff] }
 0x1c4   :  { %607 = vmatpush.msrb.mxu0 %v1254_v63  ;;  %649 = vmatpush.msrb.mxu2 %v1248_v14  ;;  %v1305_v63 = vld [vmem:[%s2907_s5 + $0x230] sm:$0xff] }
 0x1c5   :  { %669 = vmatpush.msrb.mxu3 %v1249_v15  ;;  %774 = vmatpush.msra.mxu1 %v1323_v0  ;;  %v1337_v14 = vld [vmem:[%s2907_s5 + $0x330] sm:$0xff]  ;;  %v916_v0 = vld [vmem:[%s2912_s9 + $0x180] sm:$0xff] }
 0x1c6   :  { %608 = vmatpush.msrb.mxu0 %v1250_v5  ;;  %650 = vmatpush.msrb.mxu2 %v1244_v25  ;;  %v1339_v5 = vld [vmem:[%s2907_s5 + $0x340] sm:$0xff]  ;;  %v1353_v15 = vld [vmem:[%s2907_s5 + $0x3b0] sm:$0xff] }
 0x1c7   :  { %670 = vmatpush.msrb.mxu3 %v1245_v26  ;;  %v1299_v25 = vld [vmem:[%s2907_s5 + $0x200] sm:$0xff]  ;;  %v1317_v26 = vld [vmem:[%s2907_s5 + $0x290] sm:$0xff] }
 0x1c8   :  { %609 = vmatpush.msrb.mxu0 %v1246_v11  ;;  %651 = vmatpush.msrb.mxu2 %v1240_v29  ;;  %v1302_v11 = vld [vmem:[%s2907_s5 + $0x218] sm:$0xff]  ;;  %v841_v29 = vld [vmem:[%s2911_s7 + $0x68] sm:$0xff] }
 0x1c9   :  { %671 = vmatpush.msrb.mxu3 %v1241_v30  ;;  %v840_v30 = vld [vmem:[%s2911_s7 + $0x60] sm:$0xff] }
 0x1ca   :  { %610 = vmatpush.msrb.mxu0 %v1242_v23  ;;  %652 = vmatpush.msrb.mxu2 %v1236_v33  ;;  %v837_v33 = vld [vmem:[%s2911_s7 + $0x48] sm:$0xff] }
 0x1cb   :  { %672 = vmatpush.msrb.mxu3 %v1237_v34  ;;  %v836_v34 = vld [vmem:[%s2911_s7 + $0x40] sm:$0xff] }
 0x1cc   :  { %611 = vmatpush.msrb.mxu0 %v1238_v27  ;;  %787 = vmatpush.msra.mxu2 %v1346_v43  ;;  %v843_v27 = vld [vmem:[%s2911_s7 + $0x78] sm:$0xff] }
 0x1cd   :  { %v1350_v43 = vld [vmem:[%s2907_s5 + $0x398] sm:$0xff] }
 0x1ce   :  { %612 = vmatpush.msrb.mxu0 %v1234_v31  ;;  %788 = vmatpush.msra.mxu2 %v1345_v45  ;;  %v839_v31 = vld [vmem:[%s2911_s7 + $0x58] sm:$0xff]  ;;  %v1333_v45 = vld [vmem:[%s2907_s5 + $0x310] sm:$0xff] }
 0x1d0   :  { %747 = vmatpush.msra.mxu0 %v1314_v35  ;;  %789 = vmatpush.msra.mxu2 %v1344_v49  ;;  %v835_v35 = vld [vmem:[%s2911_s7 + $0x38] sm:$0xff]  ;;  %v1348_v49 = vld [vmem:[%s2907_s5 + $0x388] sm:$0xff] }
 0x1d2   :  { %748 = vmatpush.msra.mxu0 %v1313_v36  ;;  %790 = vmatpush.msra.mxu2 %v1343_v53  ;;  %v834_v36 = vld [vmem:[%s2911_s7 + $0x30] sm:$0xff]  ;;  %v829_v53 = vld [vmem:[%s2911_s7 + $0x8] sm:$0xff] }
 0x1d4   :  { %749 = vmatpush.msra.mxu0 %v1312_v37  ;;  %791 = vmatpush.msra.mxu2 %v1342_v57  ;;  %v1316_v37 = vld [vmem:[%s2907_s5 + $0x288] sm:$0xff]  ;;  %v930_v57 = vld [vmem:[%s2912_s9 + $0x1f0] sm:$0xff] }
 0x1d6   :  { %750 = vmatpush.msra.mxu0 %v1311_v38  ;;  %792 = vmatpush.msra.mxu2 %v1341_v61  ;;  %v1335_v38 = vld [vmem:[%s2907_s5 + $0x320] sm:$0xff] }
 0x1d7   :  { %v920_v61 = vld [vmem:[%s2912_s9 + $0x1a0] sm:$0xff] }
 0x1d8   :  { %751 = vmatpush.msra.mxu0 %v1310_v41  ;;  %v1315_v41 = vld [vmem:[%s2907_s5 + $0x280] sm:$0xff] }
 0x1da   :  { %752 = vmatpush.msra.mxu0 %v1309_v46  ;;  %v1349_v46 = vld [vmem:[%s2907_s5 + $0x390] sm:$0xff] }
 0x1dc   :  { %753 = vmatpush.msra.mxu0 %v1308_v51  ;;  %v1331_v51 = vld [vmem:[%s2907_s5 + $0x300] sm:$0xff] }
 0x1de   :  { %754 = vmatpush.msra.mxu0 %v1307_v55  ;;  %v928_v55 = vld [vmem:[%s2912_s9 + $0x1e0] sm:$0xff] }
 0x1e0   :  { %755 = vmatpush.msra.mxu0 %v1306_v59  ;;  %v925_v59 = vld [vmem:[%s2912_s9 + $0x1c8] sm:$0xff] }
 0x1e2   :  { %756 = vmatpush.msra.mxu0 %v1305_v63  ;;  %v922_v63 = vld [vmem:[%s2912_s9 + $0x1b0] sm:$0xff] }
 0x1e4   :  { %757 = vmatpush.msra.mxu0 %v1304_v3  ;;  %v912_v3 = vld [vmem:[%s2912_s9 + $0x160] sm:$0xff] }
 0x223   :  { %v411_v13 = vpop.f32.mrf.mxu0  ;;  %v431_v18 = vpop.f32.mrf.mxu1 }
 0x22e   :  { %v371_v1 = vpop.f32.mrf.mxu2  ;;  %v391_v7 = vpop.f32.mrf.mxu3 }
 0x22f   :  { %v372_v4 = vadd.f32 %v1366_v58, %v371_v1  ;;  %v1358_v58 = vld [vmem:[%s2907_s5 + $0x3d8] sm:$0xff]  ;;  %v1340_v1 = vld [vmem:[%s2907_s5 + $0x348] sm:$0xff] }
 0x230   :  { %793 = vmatpush.msra.mxu2 %v1340_v1  ;;  %v917_v1 = vld [vmem:[%s2912_s9 + $0x188] sm:$0xff] }
 0x231   :  { %v392_v10 = vadd.f32 %v391_v7, %v372_v4  ;;  %v1322_v4 = vld [vmem:[%s2907_s5 + $0x2b8] sm:$0xff]  ;;  %v1303_v7 = vld [vmem:[%s2907_s5 + $0x220] sm:$0xff] }
 0x232   :  { %775 = vmatpush.msra.mxu1 %v1322_v4  ;;  %794 = vmatpush.msra.mxu2 %v1339_v5  ;;  %v913_v4 = vld [vmem:[%s2912_s9 + $0x168] sm:$0xff]  ;;  %v914_v5 = vld [vmem:[%s2912_s9 + $0x170] sm:$0xff] }
 0x233   :  { %v412_v16 = vadd.f32 %v411_v13, %v392_v10  ;;  %v1354_v10 = vld [vmem:[%s2907_s5 + $0x3b8] sm:$0xff]  ;;  %v1368_v13 = vld [vmem:[%s2904_s2 + $0x3] ss:$0 sm:$0xff]  ;;  %758 = vmatpush.msra.mxu0 %v1303_v7  ;;  %v909_v7 = vld [vmem:[%s2912_s9 + $0x148] sm:$0xff] }
 0x234   :  { %776 = vmatpush.msra.mxu1 %v1321_v8  ;;  %795 = vmatpush.msra.mxu2 %v1338_v9  ;;  %v910_v8 = vld [vmem:[%s2912_s9 + $0x150] sm:$0xff]  ;;  %v904_v9 = vld [vmem:[%s2912_s9 + $0x120] sm:$0xff] }
 0x235   :  { %v432_v19 = vadd.f32 %v431_v18, %v412_v16  ;;  %v1301_v16 = vld [vmem:[%s2907_s5 + $0x210] sm:$0xff]  ;;  %759 = vmatpush.msra.mxu0 %v1302_v11  ;;  %v1336_v18 = vld [vmem:[%s2907_s5 + $0x328] sm:$0xff] }
 0x236   :  { %v474_v20 = vpop.f32.mrf.mxu2  ;;  %777 = vmatpush.msra.mxu1 %v1320_v12  ;;  %796 = vmatpush.msra.mxu2 %v1337_v14  ;;  %v906_v11 = vld [vmem:[%s2912_s9 + $0x130] sm:$0xff]  ;;  %v900_v12 = vld [vmem:[%s2912_s9 + $0x100] sm:$0xff] }
 0x237   :  { %434 = vst [vmem:[%s2910_s13] sm:$0xff] %v432_v19  ;;  %v475_v21 = vadd.f32 %v1367_v17, %v474_v20  ;;  %v1319_v17 = vld [vmem:[%s2907_s5 + $0x2a0] sm:$0xff]  ;;  %v1352_v19 = vld [vmem:[%s2907_s5 + $0x3a8] sm:$0xff]  ;;  %760 = vmatpush.msra.mxu0 %v1301_v16  ;;  %v902_v14 = vld [vmem:[%s2912_s9 + $0x110] sm:$0xff] }
 0x238   :  { %778 = vmatpush.msra.mxu1 %v1319_v17  ;;  %797 = vmatpush.msra.mxu2 %v1336_v18  ;;  %v1298_v16 = vld [vmem:[%s2908_s4 + $0x4] sm:$0xf]  ;;  %v897_v17 = vld [vmem:[%s2912_s9 + $0xe8] sm:$0xff]  ;;  %v898_v18 = vld [vmem:[%s2912_s9 + $0xf0] sm:$0xff] }
 0x239   :  { %v477_v22 = vmax.f32 %v475_v21, 0.0  ;;  %v1300_v21 = vld [vmem:[%s2907_s5 + $0x208] sm:$0xff] }
 0x23a   :  { %761 = vmatpush.msra.mxu0 %v1300_v21  ;;  %798 = vmatpush.msra.mxu2 %v1335_v38  ;;  %v894_v21 = vld [vmem:[%s2912_s9 + $0xd0] sm:$0xff]  ;;  %v919_v38 = vld [vmem:[%s2912_s9 + $0x198] sm:$0xff] }
 0x23b   :  { %516 = vmatmul.f32.vlgmr.msra.gmra.mxu3 %v477_v22  ;;  %v1318_v22 = vld [vmem:[%s2907_s5 + $0x298] sm:$0xff] }
 0x23c   :  { %807 = vmatpush.msra.mxu3 %v1362_v44  ;;  %779 = vmatpush.msra.mxu1 %v1318_v22  ;;  %v832_v44 = vld [vmem:[%s2911_s7 + $0x20] sm:$0xff]  ;;  %v589_v22 = vperm.slane %v1298_v16, 0 }
 0x23d   :  { %762 = vmatpush.msra.mxu0 %v1299_v25  ;;  %799 = vmatpush.msra.mxu2 %v1334_v42  ;;  %v903_v42 = vld [vmem:[%s2912_s9 + $0x118] sm:$0xff] }
 0x23e   :  { %808 = vmatpush.msra.mxu3 %v1361_v48  ;;  %780 = vmatpush.msra.mxu1 %v1317_v26  ;;  %v1332_v48 = vld [vmem:[%s2907_s5 + $0x308] sm:$0xff] }
 0x23f   :  { %800 = vmatpush.msra.mxu2 %v1333_v45  ;;  %v889_v45 = vld [vmem:[%s2912_s9 + $0xa8] sm:$0xff] }
 0x240   :  { %809 = vmatpush.msra.mxu3 %v1360_v50  ;;  %781 = vmatpush.msra.mxu1 %v1316_v37  ;;  %v830_v50 = vld [vmem:[%s2911_s7 + $0x10] sm:$0xff] }
 0x241   :  { %801 = vmatpush.msra.mxu2 %v1332_v48  ;;  %v884_v48 = vld [vmem:[%s2912_s9 + $0x80] sm:$0xff] }
 0x242   :  { %810 = vmatpush.msra.mxu3 %v1359_v54  ;;  %782 = vmatpush.msra.mxu1 %v1315_v41  ;;  %v828_v54 = vld [vmem:[%s2911_s7] sm:$0xff]  ;;  %v907_v41 = vld [vmem:[%s2912_s9 + $0x138] sm:$0xff] }
 0x243   :  { %802 = vmatpush.msra.mxu2 %v1331_v51  ;;  %v887_v51 = vld [vmem:[%s2912_s9 + $0x98] sm:$0xff] }
 0x244   :  { %811 = vmatpush.msra.mxu3 %v1358_v58  ;;  %v924_v58 = vld [vmem:[%s2912_s9 + $0x1c0] sm:$0xff] }
 0x246   :  { %812 = vmatpush.msra.mxu3 %v1357_v62  ;;  %v921_v62 = vld [vmem:[%s2912_s9 + $0x1a8] sm:$0xff] }
 0x248   :  { %813 = vmatpush.msra.mxu3 %v1356_v2  ;;  %v918_v2 = vld [vmem:[%s2912_s9 + $0x190] sm:$0xff] }
 0x24a   :  { %814 = vmatpush.msra.mxu3 %v1355_v6  ;;  %v908_v6 = vld [vmem:[%s2912_s9 + $0x140] sm:$0xff] }
 0x24c   :  { %815 = vmatpush.msra.mxu3 %v1354_v10  ;;  %v905_v10 = vld [vmem:[%s2912_s9 + $0x128] sm:$0xff] }
 0x24e   :  { %816 = vmatpush.msra.mxu3 %v1353_v15  ;;  %v896_v15 = vld [vmem:[%s2912_s9 + $0xe0] sm:$0xff] }
 0x250   :  { %817 = vmatpush.msra.mxu3 %v1352_v19  ;;  %v892_v19 = vld [vmem:[%s2912_s9 + $0xc0] sm:$0xff] }
 0x252   :  { %818 = vmatpush.msra.mxu3 %v1351_v39  ;;  %v915_v39 = vld [vmem:[%s2912_s9 + $0x178] sm:$0xff] }
 0x254   :  { %819 = vmatpush.msra.mxu3 %v1350_v43  ;;  %v895_v43 = vld [vmem:[%s2912_s9 + $0xd8] sm:$0xff] }
 0x256   :  { %820 = vmatpush.msra.mxu3 %v1349_v46  ;;  %v890_v46 = vld [vmem:[%s2912_s9 + $0xb0] sm:$0xff] }
 0x258   :  { %821 = vmatpush.msra.mxu3 %v1348_v49  ;;  %v885_v49 = vld [vmem:[%s2912_s9 + $0x88] sm:$0xff] }
 0x25a   :  { %822 = vmatpush.msra.mxu3 %v1347_v52  ;;  %v880_v52 = vld [vmem:[%s2912_s9 + $0x60] sm:$0xff] }
 0x2be   :  { %v517_v20 = vpop.f32.mrf.mxu3 }
 0x2bf   :  { %v518_v23 = vadd.f32 %v1368_v13, %v517_v20  ;;  %v901_v13 = vld [vmem:[%s2912_s9 + $0x108] sm:$0xff] }
 0x2c0   :  { %v893_v20 = vld [vmem:[%s2912_s9 + $0xc8] sm:$0xff] }
 0x2c1   :  { %v2401_v24 = vmax.f32 %v518_v23, 0.0  ;;  %v590_v23 = vperm.slane %v1298_v16, 1 }
 0x2c3   :  { %613 = vmatmul.f32.vlgmr.msrb.gmra.mxu0 %v2401_v24  ;;  %633 = vmatmul.f32.vlgmr.msrb.gmra.mxu1 %v2401_v24 }
 0x2c4   :  { %653 = vmatmul.f32.vlgmr.msrb.gmra.mxu2 %v2401_v24  ;;  %673 = vmatmul.f32.vlgmr.msrb.gmra.mxu3 %v2401_v24 }
 0x2c5   :  { %848 = vmatpush.msrb.mxu0 %v843_v27  ;;  %942 = vmatpush.msrb.mxu1 %v928_v55  ;;  %v883_v55 = vld [vmem:[%s2912_s9 + $0x78] sm:$0xff] }
 0x2c6   :  { %962 = vmatpush.msrb.mxu2 %v929_v56  ;;  %982 = vmatpush.msrb.mxu3 %v930_v57  ;;  %v876_v56 = vld [vmem:[%s2912_s9 + $0x40] sm:$0xff]  ;;  %v877_v57 = vld [vmem:[%s2912_s9 + $0x48] sm:$0xff] }
 0x2c7   :  { %849 = vmatpush.msrb.mxu0 %v842_v28  ;;  %943 = vmatpush.msrb.mxu1 %v924_v58  ;;  %v878_v58 = vld [vmem:[%s2912_s9 + $0x50] sm:$0xff] }
 0x2c8   :  { %963 = vmatpush.msrb.mxu2 %v925_v59  ;;  %983 = vmatpush.msrb.mxu3 %v926_v60  ;;  %v879_v59 = vld [vmem:[%s2912_s9 + $0x58] sm:$0xff]  ;;  %v872_v60 = vld [vmem:[%s2912_s9 + $0x20] sm:$0xff] }
 0x2c9   :  { %850 = vmatpush.msrb.mxu0 %v841_v29  ;;  %944 = vmatpush.msrb.mxu1 %v920_v61  ;;  %v931_v29 = vld [vmem:[%s2912_s9 + $0x1f8] sm:$0xff]  ;;  %v873_v61 = vld [vmem:[%s2912_s9 + $0x28] sm:$0xff] }
 0x2ca   :  { %964 = vmatpush.msrb.mxu2 %v921_v62  ;;  %984 = vmatpush.msrb.mxu3 %v922_v63  ;;  %v874_v62 = vld [vmem:[%s2912_s9 + $0x30] sm:$0xff]  ;;  %v875_v63 = vld [vmem:[%s2912_s9 + $0x38] sm:$0xff] }
 0x2cb   :  { %851 = vmatpush.msrb.mxu0 %v840_v30  ;;  %945 = vmatpush.msrb.mxu1 %v916_v0  ;;  %v927_v30 = vld [vmem:[%s2912_s9 + $0x1d8] sm:$0xff]  ;;  %v868_v0 = vld [vmem:[%s2912_s9] sm:$0xff] }
 0x2cc   :  { %965 = vmatpush.msrb.mxu2 %v917_v1  ;;  %985 = vmatpush.msrb.mxu3 %v918_v2  ;;  %v869_v1 = vld [vmem:[%s2912_s9 + $0x8] sm:$0xff]  ;;  %v870_v2 = vld [vmem:[%s2912_s9 + $0x10] sm:$0xff] }
 0x2cd   :  { %852 = vmatpush.msrb.mxu0 %v839_v31  ;;  %946 = vmatpush.msrb.mxu1 %v912_v3  ;;  %v591_v31 = vperm.slane %v1298_v16, 2  ;;  %v871_v3 = vld [vmem:[%s2912_s9 + $0x18] sm:$0xff] }
 0x2ce   :  { %966 = vmatpush.msrb.mxu2 %v913_v4  ;;  %986 = vmatpush.msrb.mxu3 %v914_v5  ;;  %v1037_v4 = vld [vmem:[%s2914_s11 + $0x78] sm:$0xff] }
 0x2cf   :  { %853 = vmatpush.msrb.mxu0 %v838_v32  ;;  %947 = vmatpush.msrb.mxu1 %v908_v6  ;;  %v592_v32 = vperm.slane %v1298_v16, 3  ;;  %v1085_v5 = vld [vmem:[%s2914_s11 + $0x1f8] sm:$0xff]  ;;  %v1036_v6 = vld [vmem:[%s2914_s11 + $0x70] sm:$0xff]  ;;  %v1051_v16 = vld [vmem:[%s2914_s11 + $0xe8] sm:$0xff] }
 0x2d0   :  { %967 = vmatpush.msrb.mxu2 %v909_v7  ;;  %987 = vmatpush.msrb.mxu3 %v910_v8  ;;  %v1084_v7 = vld [vmem:[%s2914_s11 + $0x1f0] sm:$0xff]  ;;  %v1035_v8 = vld [vmem:[%s2914_s11 + $0x68] sm:$0xff] }
 0x2d1   :  { %854 = vmatpush.msrb.mxu0 %v837_v33  ;;  %948 = vmatpush.msrb.mxu1 %v904_v9  ;;  %v923_v33 = vld [vmem:[%s2912_s9 + $0x1b8] sm:$0xff]  ;;  %v1083_v9 = vld [vmem:[%s2914_s11 + $0x1e8] sm:$0xff] }
 0x2d2   :  { %968 = vmatpush.msrb.mxu2 %v905_v10  ;;  %988 = vmatpush.msrb.mxu3 %v906_v11  ;;  %v1053_v10 = vld [vmem:[%s2914_s11 + $0xf8] sm:$0xff] }
 0x2d3   :  { %855 = vmatpush.msrb.mxu0 %v836_v34  ;;  %949 = vmatpush.msrb.mxu1 %v900_v12  ;;  %v1069_v11 = vld [vmem:[%s2914_s11 + $0x178] sm:$0xff]  ;;  %v1052_v12 = vld [vmem:[%s2914_s11 + $0xf0] sm:$0xff] }
 0x2d4   :  { %969 = vmatpush.msrb.mxu2 %v901_v13  ;;  %989 = vmatpush.msrb.mxu3 %v902_v14  ;;  %v1034_v13 = vld [vmem:[%s2914_s11 + $0x60] sm:$0xff] }
 0x2d5   :  { %856 = vmatpush.msrb.mxu0 %v835_v35  ;;  %950 = vmatpush.msrb.mxu1 %v896_v15  ;;  %v1082_v14 = vld [vmem:[%s2914_s11 + $0x1e0] sm:$0xff]  ;;  %v1068_v15 = vld [vmem:[%s2914_s11 + $0x170] sm:$0xff] }
 0x2d6   :  { %970 = vmatpush.msrb.mxu2 %v897_v17  ;;  %990 = vmatpush.msrb.mxu3 %v898_v18  ;;  %v1067_v17 = vld [vmem:[%s2914_s11 + $0x168] sm:$0xff]  ;;  %v1033_v18 = vld [vmem:[%s2914_s11 + $0x58] sm:$0xff] }
 0x2d7   :  { %857 = vmatpush.msrb.mxu0 %v834_v36  ;;  %951 = vmatpush.msrb.mxu1 %v892_v19  ;;  %v1081_v19 = vld [vmem:[%s2914_s11 + $0x1d8] sm:$0xff] }
 0x2d8   :  { %971 = vmatpush.msrb.mxu2 %v893_v20  ;;  %991 = vmatpush.msrb.mxu3 %v894_v21  ;;  %v1050_v20 = vld [vmem:[%s2914_s11 + $0xe0] sm:$0xff] }
 0x2d9   :  { %858 = vmatpush.msrb.mxu0 %v833_v40  ;;  %v911_v40 = vld [vmem:[%s2912_s9 + $0x158] sm:$0xff]  ;;  %v1066_v21 = vld [vmem:[%s2914_s11 + $0x160] sm:$0xff] }
 0x2da   :  { %972 = vmatpush.msrb.mxu2 %v889_v45  ;;  %992 = vmatpush.msrb.mxu3 %v890_v46  ;;  %v1075_v45 = vld [vmem:[%s2914_s11 + $0x1a8] sm:$0xff]  ;;  %v1370_v46 = vld [vmem:[%s2913_s8] ss:$0 sm:$0xff] }
 0x2db   :  { %859 = vmatpush.msrb.mxu0 %v832_v44  ;;  %v888_v44 = vld [vmem:[%s2912_s9 + $0xa0] sm:$0xff] }
 0x2dc   :  { %952 = vmatpush.msrb.mxu1 %v888_v44  ;;  %973 = vmatpush.msrb.mxu2 %v885_v49  ;;  %v1027_v44 = vld [vmem:[%s2914_s11 + $0x28] sm:$0xff]  ;;  %v1026_v49 = vld [vmem:[%s2914_s11 + $0x20] sm:$0xff] }
 0x2dd   :  { %860 = vmatpush.msrb.mxu0 %v831_v47  ;;  %v891_v47 = vld [vmem:[%s2912_s9 + $0xb8] sm:$0xff] }
 0x2de   :  { %953 = vmatpush.msrb.mxu1 %v884_v48  ;;  %v1060_v48 = vld [vmem:[%s2914_s11 + $0x130] sm:$0xff] }
 0x2df   :  { %861 = vmatpush.msrb.mxu0 %v830_v50  ;;  %v886_v50 = vld [vmem:[%s2912_s9 + $0x90] sm:$0xff] }
 0x2e0   :  { %993 = vmatpush.msrb.mxu3 %v886_v50  ;;  %954 = vmatpush.msrb.mxu1 %v880_v52  ;;  %v1074_v50 = vld [vmem:[%s2914_s11 + $0x1a0] sm:$0xff]  ;;  %v1059_v52 = vld [vmem:[%s2914_s11 + $0x128] sm:$0xff] }
 0x2e1   :  { %862 = vmatpush.msrb.mxu0 %v829_v53  ;;  %v881_v53 = vld [vmem:[%s2912_s9 + $0x68] sm:$0xff] }
 0x2e2   :  { %974 = vmatpush.msrb.mxu2 %v881_v53  ;;  %955 = vmatpush.msrb.mxu1 %v876_v56  ;;  %v1025_v56 = vld [vmem:[%s2914_s11 + $0x18] sm:$0xff] }
 0x2e3   :  { %863 = vmatpush.msrb.mxu0 %v828_v54  ;;  %v882_v54 = vld [vmem:[%s2912_s9 + $0x70] sm:$0xff] }
 0x2e4   :  { %994 = vmatpush.msrb.mxu3 %v882_v54  ;;  %975 = vmatpush.msrb.mxu2 %v877_v57  ;;  %v1073_v57 = vld [vmem:[%s2914_s11 + $0x198] sm:$0xff] }
 0x2e5   :  { %956 = vmatpush.msrb.mxu1 %v872_v60  ;;  %v1024_v60 = vld [vmem:[%s2914_s11 + $0x10] sm:$0xff] }
 0x2e6   :  { %995 = vmatpush.msrb.mxu3 %v878_v58  ;;  %976 = vmatpush.msrb.mxu2 %v873_v61  ;;  %v1072_v61 = vld [vmem:[%s2914_s11 + $0x190] sm:$0xff] }
 0x2e7   :  { %957 = vmatpush.msrb.mxu1 %v868_v0 }
 0x2e8   :  { %996 = vmatpush.msrb.mxu3 %v874_v62  ;;  %977 = vmatpush.msrb.mxu2 %v869_v1 }
 0x2ea   :  { %997 = vmatpush.msrb.mxu3 %v870_v2  ;;  %v1023_v2 = vld [vmem:[%s2914_s11 + $0x8] sm:$0xff] }
 0x340   :  { %v614_v25 = vpop.f32.mrf.mxu0  ;;  %v634_v26 = vpop.f32.mrf.mxu1 }
 0x341   :  { %v615_v27 = vadd.f32 %v614_v25, %v589_v22  ;;  %v635_v28 = vadd.f32 %v634_v26, %v590_v23  ;;  %v1032_v22 = vld [vmem:[%s2914_s11 + $0x50] sm:$0xff]  ;;  %v1049_v25 = vld [vmem:[%s2914_s11 + $0xd8] sm:$0xff] }
 0x342   :  { %v1080_v23 = vld [vmem:[%s2914_s11 + $0x1d0] sm:$0xff]  ;;  %v1065_v26 = vld [vmem:[%s2914_s11 + $0x158] sm:$0xff] }
 0x343   :  { %763 = vmatmul.f32.vlgmr.msra.gmra.mxu0 %v615_v27  ;;  %783 = vmatmul.f32.vlgmr.msra.gmra.mxu1 %v635_v28  ;;  %v1031_v27 = vld [vmem:[%s2914_s11 + $0x48] sm:$0xff] }
 0x344   :  { %1002 = vmatpush.msra.mxu0 %v931_v29  ;;  %1090 = vmatpush.msra.mxu1 %v1037_v4  ;;  %v1079_v28 = vld [vmem:[%s2914_s11 + $0x1c8] sm:$0xff]  ;;  %v1048_v29 = vld [vmem:[%s2914_s11 + $0xd0] sm:$0xff]  ;;  %v1058_v4 = vld [vmem:[%s2914_s11 + $0x120] sm:$0xff] }
 0x346   :  { %1003 = vmatpush.msra.mxu0 %v927_v30  ;;  %1091 = vmatpush.msra.mxu1 %v1036_v6  ;;  %v1064_v30 = vld [vmem:[%s2914_s11 + $0x150] sm:$0xff]  ;;  %v1022_v6 = vld [vmem:[%s2914_s11] sm:$0xff] }
 0x347   :  { %v654_v34 = vpop.f32.mrf.mxu2  ;;  %v674_v35 = vpop.f32.mrf.mxu3 }
 0x348   :  { %v655_v36 = vadd.f32 %v654_v34, %v591_v31  ;;  %v675_v37 = vadd.f32 %v674_v35, %v592_v32  ;;  %1004 = vmatpush.msra.mxu0 %v923_v33  ;;  %1092 = vmatpush.msra.mxu1 %v1035_v8  ;;  %v1030_v31 = vld [vmem:[%s2914_s11 + $0x40] sm:$0xff]  ;;  %v1047_v33 = vld [vmem:[%s2914_s11 + $0xc8] sm:$0xff]  ;;  %v1057_v8 = vld [vmem:[%s2914_s11 + $0x118] sm:$0xff] }
 0x349   :  { %v1078_v32 = vld [vmem:[%s2914_s11 + $0x1c0] sm:$0xff]  ;;  %v1063_v34 = vld [vmem:[%s2914_s11 + $0x148] sm:$0xff] }
 0x34a   :  { %803 = vmatmul.f32.vlgmr.msra.gmra.mxu2 %v655_v36  ;;  %823 = vmatmul.f32.vlgmr.msra.gmra.mxu3 %v675_v37  ;;  %v1029_v36 = vld [vmem:[%s2914_s11 + $0x38] sm:$0xff] }
 0x34b   :  { %864 = vmatmul.f32.vlgmr.msrb.gmra.mxu0 %v2401_v24  ;;  %v899_v24 = vld [vmem:[%s2912_s9 + $0xf8] sm:$0xff]  ;;  %1110 = vmatpush.msra.mxu2 %v1053_v10  ;;  %v1040_v10 = vld [vmem:[%s2914_s11 + $0x90] sm:$0xff] }
 0x34c   :  { %1005 = vmatpush.msra.mxu0 %v919_v38  ;;  %1130 = vmatpush.msra.mxu3 %v1069_v11  ;;  %v1077_v37 = vld [vmem:[%s2914_s11 + $0x1b8] sm:$0xff]  ;;  %v1046_v38 = vld [vmem:[%s2914_s11 + $0xc0] sm:$0xff]  ;;  %v1056_v11 = vld [vmem:[%s2914_s11 + $0x110] sm:$0xff] }
 0x34d   :  { %1111 = vmatpush.msra.mxu2 %v1052_v12  ;;  %1093 = vmatpush.msra.mxu1 %v1034_v13  ;;  %v1039_v12 = vld [vmem:[%s2914_s11 + $0x88] sm:$0xff] }
 0x34e   :  { %1006 = vmatpush.msra.mxu0 %v915_v39  ;;  %1131 = vmatpush.msra.mxu3 %v1068_v15  ;;  %v1062_v39 = vld [vmem:[%s2914_s11 + $0x140] sm:$0xff]  ;;  %v1055_v13 = vld [vmem:[%s2914_s11 + $0x108] sm:$0xff] }
 0x34f   :  { %1112 = vmatpush.msra.mxu2 %v1051_v16  ;;  %1094 = vmatpush.msra.mxu1 %v1033_v18  ;;  %v1054_v15 = vld [vmem:[%s2914_s11 + $0x100] sm:$0xff] }
 0x350   :  { %1007 = vmatpush.msra.mxu0 %v911_v40  ;;  %1132 = vmatpush.msra.mxu3 %v1067_v17  ;;  %v1028_v40 = vld [vmem:[%s2914_s11 + $0x30] sm:$0xff]  ;;  %v932_v16 = vld [vmem:[%s2917_s10] sm:$0xf] }
 0x351   :  { %1113 = vmatpush.msra.mxu2 %v1050_v20  ;;  %1095 = vmatpush.msra.mxu1 %v1032_v22  ;;  %v934_v17 = vperm.slane %v932_v16, 0  ;;  %v937_v18 = vperm.slane %v932_v16, 3 }
 0x352   :  { %1008 = vmatpush.msra.mxu0 %v907_v41  ;;  %1133 = vmatpush.msra.mxu3 %v1066_v21  ;;  %v1076_v41 = vld [vmem:[%s2914_s11 + $0x1b0] sm:$0xff] }
 0x353   :  { %1114 = vmatpush.msra.mxu2 %v1049_v25  ;;  %1096 = vmatpush.msra.mxu1 %v1031_v27  ;;  %v936_v25 = vperm.slane %v932_v16, 2 }
 0x354   :  { %1009 = vmatpush.msra.mxu0 %v903_v42  ;;  %1134 = vmatpush.msra.mxu3 %v1065_v26  ;;  %v1045_v42 = vld [vmem:[%s2914_s11 + $0xb8] sm:$0xff] }
 0x355   :  { %1115 = vmatpush.msra.mxu2 %v1048_v29  ;;  %1097 = vmatpush.msra.mxu1 %v1030_v31 }
 0x356   :  { %1010 = vmatpush.msra.mxu0 %v899_v24  ;;  %1135 = vmatpush.msra.mxu3 %v1064_v30  ;;  %v1061_v24 = vld [vmem:[%s2914_s11 + $0x138] sm:$0xff]  ;;  %v1371_v30 = vld [vmem:[%s2916_s12] ss:$0 sm:$0xff] }
 0x357   :  { %1116 = vmatpush.msra.mxu2 %v1047_v33  ;;  %1098 = vmatpush.msra.mxu1 %v1029_v36 }
 0x358   :  { %1011 = vmatpush.msra.mxu0 %v895_v43  ;;  %1136 = vmatpush.msra.mxu3 %v1063_v34  ;;  %v1369_v43 = vld [vmem:[%s2909_s6 + $0x1] ss:$0 sm:$0xff] }
 0x359   :  { %1117 = vmatpush.msra.mxu2 %v1046_v38  ;;  %1099 = vmatpush.msra.mxu1 %v1028_v40 }
 0x35a   :  { %1012 = vmatpush.msra.mxu0 %v891_v47  ;;  %1137 = vmatpush.msra.mxu3 %v1062_v39  ;;  %v1044_v47 = vld [vmem:[%s2914_s11 + $0xb0] sm:$0xff] }
 0x35b   :  { %1118 = vmatpush.msra.mxu2 %v1045_v42  ;;  %1100 = vmatpush.msra.mxu1 %v1027_v44 }
 0x35c   :  { %1013 = vmatpush.msra.mxu0 %v887_v51  ;;  %1138 = vmatpush.msra.mxu3 %v1061_v24  ;;  %v1043_v51 = vld [vmem:[%s2914_s11 + $0xa8] sm:$0xff] }
 0x35d   :  { %1119 = vmatpush.msra.mxu2 %v1044_v47  ;;  %1101 = vmatpush.msra.mxu1 %v1026_v49 }
 0x35e   :  { %1014 = vmatpush.msra.mxu0 %v883_v55  ;;  %1139 = vmatpush.msra.mxu3 %v1060_v48 }
 0x35f   :  { %1120 = vmatpush.msra.mxu2 %v1043_v51  ;;  %1102 = vmatpush.msra.mxu1 %v1025_v56 }
 0x360   :  { %1015 = vmatpush.msra.mxu0 %v879_v59  ;;  %1140 = vmatpush.msra.mxu3 %v1059_v52 }
 0x361   :  { %1103 = vmatpush.msra.mxu1 %v1024_v60 }
 0x362   :  { %1016 = vmatpush.msra.mxu0 %v875_v63  ;;  %1141 = vmatpush.msra.mxu3 %v1058_v4 }
 0x363   :  { %1104 = vmatpush.msra.mxu1 %v1023_v2 }
 0x364   :  { %1017 = vmatpush.msra.mxu0 %v871_v3  ;;  %v1042_v3 = vld [vmem:[%s2914_s11 + $0xa0] sm:$0xff]  ;;  %1142 = vmatpush.msra.mxu3 %v1057_v8 }
 0x365   :  { %1121 = vmatpush.msra.mxu2 %v1042_v3  ;;  %1105 = vmatpush.msra.mxu1 %v1022_v6 }
 0x366   :  { %1150 = vmatpush.msrb.mxu0 %v1085_v5  ;;  %v1071_v5 = vld [vmem:[%s2914_s11 + $0x188] sm:$0xff]  ;;  %1143 = vmatpush.msra.mxu3 %v1056_v11 }
 0x368   :  { %1151 = vmatpush.msrb.mxu0 %v1084_v7  ;;  %v1041_v7 = vld [vmem:[%s2914_s11 + $0x98] sm:$0xff]  ;;  %1144 = vmatpush.msra.mxu3 %v1055_v13 }
 0x369   :  { %1122 = vmatpush.msra.mxu2 %v1041_v7 }
 0x36a   :  { %1152 = vmatpush.msrb.mxu0 %v1083_v9  ;;  %v1070_v9 = vld [vmem:[%s2914_s11 + $0x180] sm:$0xff]  ;;  %1145 = vmatpush.msra.mxu3 %v1054_v15 }
 0x36b   :  { %1123 = vmatpush.msra.mxu2 %v1040_v10 }
 0x36c   :  { %1153 = vmatpush.msrb.mxu0 %v1082_v14  ;;  %v1038_v14 = vld [vmem:[%s2914_s11 + $0x80] sm:$0xff] }
 0x36d   :  { %1124 = vmatpush.msra.mxu2 %v1039_v12 }
 0x36e   :  { %1154 = vmatpush.msrb.mxu0 %v1081_v19 }
 0x36f   :  { %1125 = vmatpush.msra.mxu2 %v1038_v14 }
 0x370   :  { %1155 = vmatpush.msrb.mxu0 %v1080_v23  ;;  %v935_v23 = vperm.slane %v932_v16, 1 }
 0x372   :  { %1156 = vmatpush.msrb.mxu0 %v1079_v28 }
 0x374   :  { %1157 = vmatpush.msrb.mxu0 %v1078_v32 }
 0x376   :  { %1158 = vmatpush.msrb.mxu0 %v1077_v37 }
 0x378   :  { %1159 = vmatpush.msrb.mxu0 %v1076_v41 }
 0x37a   :  { %1160 = vmatpush.msrb.mxu0 %v1075_v45 }
 0x37c   :  { %1161 = vmatpush.msrb.mxu0 %v1074_v50 }
 0x37e   :  { %1162 = vmatpush.msrb.mxu0 %v1073_v57 }
 0x380   :  { %1163 = vmatpush.msrb.mxu0 %v1072_v61 }
 0x382   :  { %1164 = vmatpush.msrb.mxu0 %v1071_v5 }
 0x384   :  { %1165 = vmatpush.msrb.mxu0 %v1070_v9 }
 0x3c0   :  { %v764_v35 = vpop.f32.mrf.mxu0  ;;  %v784_v58 = vpop.f32.mrf.mxu1 }
 0x3c1   :  { %v765_v53 = vadd.f32 %v1369_v43, %v764_v35 }
 0x3c3   :  { %v785_v59 = vadd.f32 %v784_v58, %v765_v53 }
 0x3c8   :  { %v865_v54 = vpop.f32.mrf.mxu0 }
 0x3c9   :  { %v866_v55 = vadd.f32 %v1370_v46, %v865_v54 }
 0x3cb   :  { %958 = vmatmul.f32.vlgmr.msrb.gmra.mxu1 %v866_v55  ;;  %978 = vmatmul.f32.vlgmr.msrb.gmra.mxu2 %v866_v55 }
 0x3cc   :  { %998 = vmatmul.f32.vlgmr.msrb.gmra.mxu3 %v866_v55  ;;  %1018 = vmatmul.f32.vlgmr.msra.gmra.mxu0 %v866_v55 }
 0x3cd   :  { %v804_v62 = vpop.f32.mrf.mxu2  ;;  %v824_v0 = vpop.f32.mrf.mxu3 }
 0x3ce   :  { %v805_v63 = vadd.f32 %v804_v62, %v785_v59 }
 0x3d0   :  { %v825_v1 = vadd.f32 %v824_v0, %v805_v63 }
 0x3d2   :  { %827 = vst [vmem:[%s2915_s14] sm:$0xff] %v825_v1 }
 0x448   :  { %v959_v19 = vpop.f32.mrf.mxu1 }
 0x449   :  { %v960_v20 = vadd.f32 %v959_v19, %v934_v17  ;;  %v1019_v21 = vpop.f32.mrf.mxu0 }
 0x44a   :  { %v1020_v22 = vadd.f32 %v1019_v21, %v937_v18 }
 0x44b   :  { %1106 = vmatmul.f32.vlgmr.msra.gmra.mxu1 %v960_v20 }
 0x44c   :  { %1166 = vmatmul.f32.vlgmr.msrb.gmra.mxu0 %v1020_v22 }
 0x44e   :  { %v979_v26 = vpop.f32.mrf.mxu2 }
 0x44f   :  { %v980_v27 = vadd.f32 %v979_v26, %v935_v23  ;;  %v999_v28 = vpop.f32.mrf.mxu3 }
 0x450   :  { %v1000_v29 = vadd.f32 %v999_v28, %v936_v25 }
 0x451   :  { %1126 = vmatmul.f32.vlgmr.msra.gmra.mxu2 %v980_v27 }
 0x452   :  { %1146 = vmatmul.f32.vlgmr.msra.gmra.mxu3 %v1000_v29 }
 0x4c8   :  { %v1107_v31 = vpop.f32.mrf.mxu1 }
 0x4c9   :  { %v1108_v32 = vadd.f32 %v1371_v30, %v1107_v31  ;;  %v1167_v37 = vpop.f32.mrf.mxu0 }
 0x4d4   :  { %v1127_v33 = vpop.f32.mrf.mxu2 }
 0x4d5   :  { %v1128_v34 = vadd.f32 %v1127_v33, %v1108_v32  ;;  %v1147_v35 = vpop.f32.mrf.mxu3 }
 0x4d7   :  { %v1148_v36 = vadd.f32 %v1147_v35, %v1128_v34 }
 0x4d9   :  { %v1168_v38 = vadd.f32 %v1167_v37, %v1148_v36 }
 0x4db   :  { %1170 = vst [vmem:[%s2918_s15] sm:$0xff] %v1168_v38 }

</bundles_post_ra>
